<compile_context>
chip_gen: v7x
topology: tpu7x:2x2x1
jax: 0.10.0
libtpu: 0.0.40
codegen_flags: <defaults>
</compile_context>

<pallas_src>
import jax
import jax.numpy as jnp
from jax.experimental import pallas as pl
from jax.experimental.pallas import tpu as pltpu


def encoder_kernel(x_ref, h0_ref, c0_ref, w_ih_ref, w_hh_ref, b_ref,
                   out_ref, cn_ref, xw_scr):
    """Single-invocation kernel: batched input projection + serial LSTM loop.

    x_ref:    (T, D)   embedded tokens (gathered in the wrapper)
    h0/c0:    (1, H)   initial state
    w_ih_ref: (D, 4H)  W_ih^T      w_hh_ref: (H, 4H)  W_hh^T
    b_ref:    (1, 4H)  b_ih + b_hh (folded at init)
    out_ref:  (T, H)   per-step hidden states (written back to HBM once)
    cn_ref:   (1, H)   final cell state
    xw_scr:   (T, 4H)  VMEM scratch for the hoisted input projection
    """
    T, H = out_ref.shape

    # ---- Phase 1 (non-recurrent): one (T, D) x (D, 4H) MXU matmul ----------
    xw_scr[...] = (jnp.dot(x_ref[...], w_ih_ref[...],
                           preferred_element_type=jnp.float32)
                   + b_ref[...])

    # ---- Phase 2: serial recurrence over the VMEM-resident slab ------------
    w_hh = w_hh_ref[...]                     # loaded once, resident

    def step(t, carry):
        h, c = carry
        gates = (xw_scr[pl.ds(t, 1), :]
                 + jnp.dot(h, w_hh, preferred_element_type=jnp.float32))
        # PyTorch gate order [i, f, g, o]; H = 128 -> whole 128-lane slices.
        i_g = jax.nn.sigmoid(gates[:, 0:H])
        f_g = jax.nn.sigmoid(gates[:, H:2 * H])
        g_g = jnp.tanh(gates[:, 2 * H:3 * H])
        o_g = jax.nn.sigmoid(gates[:, 3 * H:4 * H])
        c_new = f_g * c + i_g * g_g
        h_new = o_g * jnp.tanh(c_new)
        out_ref[pl.ds(t, 1), :] = h_new      # VMEM store; single HBM writeback
        return h_new, c_new

    _, c_fin = jax.lax.fori_loop(0, T, step, (h0_ref[...], c0_ref[...]),
                                 unroll=(T <= 16))
    cn_ref[...] = c_fin


def init_params(key, input_size, vocab_size, hidden_size):
    ks = jax.random.split(key, 6)
    s = 1.0 / jnp.sqrt(jnp.float32(hidden_size))
    emb = jax.random.normal(ks[0], (vocab_size, input_size), jnp.float32)
    w_ih = jax.random.uniform(ks[1], (4 * hidden_size, input_size), jnp.float32, -s, s)
    w_hh = jax.random.uniform(ks[2], (4 * hidden_size, hidden_size), jnp.float32, -s, s)
    b_ih = jax.random.uniform(ks[3], (4 * hidden_size,), jnp.float32, -s, s)
    b_hh = jax.random.uniform(ks[4], (4 * hidden_size,), jnp.float32, -s, s)
    return {
        "embedding": emb,                          # (V, D)
        "w_ih_t": w_ih.T,                          # (D, 4H)
        "w_hh_t": w_hh.T,                          # (H, 4H)
        "b": (b_ih + b_hh).reshape(1, -1),         # (1, 4H) folded once at init
    }


def unit_encoder_rnn(tokens, h0, c0, params):
    """Run the encoder over a whole token sequence with ONE pallas_call.

    tokens: (T,) int32;  h0, c0: (1, 1, H).
    Returns (outputs (T, 1, H), h_n (1, 1, H), c_n (1, 1, H)) — identical to
    calling the PyTorch forward() T times, carrying (h, c) between calls.
    """
    tokens = jnp.asarray(tokens, jnp.int32).reshape(-1)
    T = int(tokens.shape[0])
    D = params["embedding"].shape[-1]
    H = params["w_hh_t"].shape[0]

    # Embedding-row gather hoisted to plain XLA (one tiny gather, no per-step DMA).
    emb_rows = jnp.take(params["embedding"], tokens, axis=0)        # (T, D)
    h2 = h0.reshape(1, H).astype(jnp.float32)
    c2 = c0.reshape(1, H).astype(jnp.float32)

    grid_spec = pltpu.PrefetchScalarGridSpec(
        num_scalar_prefetch=0,
        grid=(1,),                                                  # single step
        in_specs=[
            pl.BlockSpec((T, D), lambda i: (0, 0)),                 # embedded tokens
            pl.BlockSpec((1, H), lambda i: (0, 0)),                 # h0
            pl.BlockSpec((1, H), lambda i: (0, 0)),                 # c0
            pl.BlockSpec((D, 4 * H), lambda i: (0, 0)),             # W_ih^T
            pl.BlockSpec((H, 4 * H), lambda i: (0, 0)),             # W_hh^T
            pl.BlockSpec((1, 4 * H), lambda i: (0, 0)),             # bias
        ],
        out_specs=[
            pl.BlockSpec((T, H), lambda i: (0, 0)),                 # all h_t (one writeback)
            pl.BlockSpec((1, H), lambda i: (0, 0)),                 # c_n
        ],
        scratch_shapes=[pltpu.VMEM((T, 4 * H), jnp.float32)],       # hoisted xW slab
    )

    out_shapes = (jax.ShapeDtypeStruct((T, H), jnp.float32),
                  jax.ShapeDtypeStruct((1, H), jnp.float32))

    outputs, c_n = pl.pallas_call(
        encoder_kernel,
        grid_spec=grid_spec,
        out_shape=out_shapes,
        compiler_params=pltpu.CompilerParams(
            dimension_semantics=("arbitrary",)),
    )(emb_rows, h2, c2, params["w_ih_t"], params["w_hh_t"], params["b"])

    h_n = outputs[T - 1:T].reshape(1, 1, H)    # h_n duplicates the last output row
    return outputs.reshape(T, 1, H), h_n, c_n.reshape(1, 1, H)


def unit_encoder_step(token, h, c, params):
    """Exact equivalent of one PyTorch forward(input, h_n, c_n) call."""
    outputs, h_n, c_n = unit_encoder_rnn(jnp.asarray(token, jnp.int32).reshape(1),
                                         h, c, params)
    return outputs, h_n, c_n   # outputs: (1, 1, H)


def reference_encoder(tokens, h0, c0, params):
    """Pure-JAX reference (sequential forward() calls) for verification."""
    D = params["embedding"].shape[-1]
    H = params["w_hh_t"].shape[0]
    h = h0.reshape(1, H)
    c = c0.reshape(1, H)
    outs = []
    for tok in list(tokens):
        x = params["embedding"][tok].reshape(1, D)
        gates = x @ params["w_ih_t"] + h @ params["w_hh_t"] + params["b"]
        i_g = jax.nn.sigmoid(gates[:, 0:H])
        f_g = jax.nn.sigmoid(gates[:, H:2 * H])
        g_g = jnp.tanh(gates[:, 2 * H:3 * H])
        o_g = jax.nn.sigmoid(gates[:, 3 * H:4 * H])
        c = f_g * c + i_g * g_g
        h = o_g * jnp.tanh(c)
        outs.append(h)
    outputs = jnp.stack(outs, axis=0)              # (T, 1, H)
    return outputs, h.reshape(1, 1, H), c.reshape(1, 1, H)


if __name__ == "__main__":
    input_size = 128     # embedding_dim (lane-aligned)
    hidden_size = 128    # lane-aligned -> gate slices are whole 128-lane tiles
    vocab_size = 64
    seq_len = 8
    # NOTE: LSTM dropout_prob is a no-op for num_layers=1 (as in PyTorch).

    key = jax.random.PRNGKey(0)
    kp, kh, kc, kt = jax.random.split(key, 4)
    params = init_params(kp, input_size, vocab_size, hidden_size)

    tokens = jax.random.randint(kt, (seq_len,), 0, vocab_size, dtype=jnp.int32)
    h0 = jax.random.uniform(kh, (1, 1, hidden_size), jnp.float32)  # initHidden(rand=True)
    c0 = jax.random.uniform(kc, (1, 1, hidden_size), jnp.float32)

    # Fused whole-sequence encode (one pallas_call, single grid step).
    outputs, h_n, c_n = unit_encoder_rnn(tokens, h0, c0, params)
    jax.block_until_ready((outputs, h_n, c_n))

    ref_out, ref_h, ref_c = reference_encoder(tokens, h0, c0, params)
    assert outputs.shape == (seq_len, 1, hidden_size)
    assert h_n.shape == (1, 1, hidden_size) and c_n.shape == (1, 1, hidden_size)
    assert jnp.allclose(outputs, ref_out, atol=1e-4)
    assert jnp.allclose(h_n, ref_h, atol=1e-4)
    assert jnp.allclose(c_n, ref_c, atol=1e-4)

    # Single-step forward() semantics: output == h_n for a one-token step.
    out1, h1, c1 = unit_encoder_step(tokens[0], h0, c0, params)
    jax.block_until_ready((out1, h1, c1))
    assert out1.shape == (1, 1, hidden_size)
    assert jnp.allclose(out1[0], h1[0], atol=1e-5)
    assert jnp.allclose(out1, ref_out[0:1], atol=1e-4)

    print("KERNEL_OK")
</pallas_src>

<mosaic_0001>
module attributes {stable_mosaic.version = 11 : i64} {
  func.func @encoder_kernel(%arg0: i32, %arg1: memref<8x128xf32, #tpu.memory_space<vmem>>, %arg2: memref<1x128xf32, #tpu.memory_space<vmem>>, %arg3: memref<1x128xf32, #tpu.memory_space<vmem>>, %arg4: memref<128x512xf32, #tpu.memory_space<vmem>>, %arg5: memref<128x512xf32, #tpu.memory_space<vmem>>, %arg6: memref<1x512xf32, #tpu.memory_space<vmem>>, %arg7: memref<8x128xf32, #tpu.memory_space<vmem>>, %arg8: memref<1x128xf32, #tpu.memory_space<vmem>>, %arg9: memref<8x512xf32, #tpu.memory_space<vmem>>) attributes {dimension_semantics = [#tpu.dimension_semantics<arbitrary>], iteration_bounds = array<i64: 1>, scalar_prefetch = 0 : i64, scratch_operands = 1 : i64, tpu.core_type = #tpu.core_type<tc>, window_params = [{pipeline_mode = #tpu.pipeline_mode<synchronous>, transform_indices = @transform_0, window_bounds = array<i64: 8, 128>}, {pipeline_mode = #tpu.pipeline_mode<synchronous>, transform_indices = @transform_1, window_bounds = array<i64: 1, 128>}, {pipeline_mode = #tpu.pipeline_mode<synchronous>, transform_indices = @transform_2, window_bounds = array<i64: 1, 128>}, {pipeline_mode = #tpu.pipeline_mode<synchronous>, transform_indices = @transform_3, window_bounds = array<i64: 128, 512>}, {pipeline_mode = #tpu.pipeline_mode<synchronous>, transform_indices = @transform_4, window_bounds = array<i64: 128, 512>}, {pipeline_mode = #tpu.pipeline_mode<synchronous>, transform_indices = @transform_5, window_bounds = array<i64: 1, 512>}, {pipeline_mode = #tpu.pipeline_mode<synchronous>, transform_indices = @transform_6, window_bounds = array<i64: 8, 128>}, {pipeline_mode = #tpu.pipeline_mode<synchronous>, transform_indices = @transform_7, window_bounds = array<i64: 1, 128>}]} {
    %c0 = arith.constant 0 : index
    %c0_0 = arith.constant 0 : index
    %0 = vector.load %arg1[%c0, %c0_0] : memref<8x128xf32, #tpu.memory_space<vmem>>, vector<8x128xf32>
    %c0_1 = arith.constant 0 : index
    %c0_2 = arith.constant 0 : index
    %1 = vector.load %arg4[%c0_1, %c0_2] : memref<128x512xf32, #tpu.memory_space<vmem>>, vector<128x512xf32>
    %cst = arith.constant dense<0.000000e+00> : vector<8x512xf32>
    %2 = tpu.matmul %0, %1, %cst {dimension_numbers = #tpu.dot_dimension_numbers<[1], [0], [0], [1], [0, 0, 1, 1], [], []>} : vector<8x128xf32>, vector<128x512xf32>, vector<8x512xf32> -> vector<8x512xf32>
    %c0_3 = arith.constant 0 : index
    %c0_4 = arith.constant 0 : index
    %3 = vector.load %arg6[%c0_3, %c0_4] : memref<1x512xf32, #tpu.memory_space<vmem>>, vector<1x512xf32>
    %4 = vector.broadcast %3 : vector<1x512xf32> to vector<8x512xf32>
    %5 = arith.addf %2, %4 : vector<8x512xf32>
    %c0_5 = arith.constant 0 : index
    %c0_6 = arith.constant 0 : index
    %6 = vector.load %arg9[%c0_5, %c0_6] : memref<8x512xf32, #tpu.memory_space<vmem>>, vector<8x512xf32>
    tpu.vector_store %arg9[%c0_5, %c0_6], %5 {strides = array<i32>} : memref<8x512xf32, #tpu.memory_space<vmem>>, vector<8x512xf32>,
    %c0_7 = arith.constant 0 : index
    %c0_8 = arith.constant 0 : index
    %7 = vector.load %arg5[%c0_7, %c0_8] : memref<128x512xf32, #tpu.memory_space<vmem>>, vector<128x512xf32>
    %c0_9 = arith.constant 0 : index
    %c0_10 = arith.constant 0 : index
    %8 = vector.load %arg2[%c0_9, %c0_10] : memref<1x128xf32, #tpu.memory_space<vmem>>, vector<1x128xf32>
    %c0_11 = arith.constant 0 : index
    %c0_12 = arith.constant 0 : index
    %9 = vector.load %arg3[%c0_11, %c0_12] : memref<1x128xf32, #tpu.memory_space<vmem>>, vector<1x128xf32>
    %c0_i32 = arith.constant 0 : i32
    %10 = arith.index_cast %c0_i32 : i32 to index
    %c0_13 = arith.constant 0 : index
    %11 = vector.load %arg9[%10, %c0_13] : memref<8x512xf32, #tpu.memory_space<vmem>>, vector<1x512xf32>
    %cst_14 = arith.constant dense<0.000000e+00> : vector<1x512xf32>
    %12 = tpu.matmul %8, %7, %cst_14 {dimension_numbers = #tpu.dot_dimension_numbers<[1], [0], [0], [1], [0, 0, 1, 1], [], []>} : vector<1x128xf32>, vector<128x512xf32>, vector<1x512xf32> -> vector<1x512xf32>
    %13 = arith.addf %11, %12 : vector<1x512xf32>
    %14 = vector.extract_strided_slice %13 {offsets = [0, 0], sizes = [1, 128], strides = [1, 1]} : vector<1x512xf32> to vector<1x128xf32>
    %15 = arith.negf %14 : vector<1x128xf32>
    %16 = math.exp %15 : vector<1x128xf32>
    %cst_15 = arith.constant 1.000000e+00 : f32
    %17 = vector.broadcast %cst_15 : f32 to vector<1x128xf32>
    %18 = arith.addf %17, %16 : vector<1x128xf32>
    %19 = arith.divf %17, %18 : vector<1x128xf32>
    %20 = vector.extract_strided_slice %13 {offsets = [0, 128], sizes = [1, 128], strides = [1, 1]} : vector<1x512xf32> to vector<1x128xf32>
    %21 = arith.negf %20 : vector<1x128xf32>
    %22 = math.exp %21 : vector<1x128xf32>
    %cst_16 = arith.constant 1.000000e+00 : f32
    %23 = vector.broadcast %cst_16 : f32 to vector<1x128xf32>
    %24 = arith.addf %23, %22 : vector<1x128xf32>
    %25 = arith.divf %23, %24 : vector<1x128xf32>
    %26 = vector.extract_strided_slice %13 {offsets = [0, 256], sizes = [1, 128], strides = [1, 1]} : vector<1x512xf32> to vector<1x128xf32>
    %27 = math.tanh %26 : vector<1x128xf32>
    %28 = vector.extract_strided_slice %13 {offsets = [0, 384], sizes = [1, 128], strides = [1, 1]} : vector<1x512xf32> to vector<1x128xf32>
    %29 = arith.negf %28 : vector<1x128xf32>
    %30 = math.exp %29 : vector<1x128xf32>
    %cst_17 = arith.constant 1.000000e+00 : f32
    %31 = vector.broadcast %cst_17 : f32 to vector<1x128xf32>
    %32 = arith.addf %31, %30 : vector<1x128xf32>
    %33 = arith.divf %31, %32 : vector<1x128xf32>
    %34 = arith.mulf %25, %9 : vector<1x128xf32>
    %35 = arith.mulf %19, %27 : vector<1x128xf32>
    %36 = arith.addf %34, %35 : vector<1x128xf32>
    %37 = math.tanh %36 : vector<1x128xf32>
    %38 = arith.mulf %33, %37 : vector<1x128xf32>
    %39 = arith.index_cast %c0_i32 : i32 to index
    %c0_18 = arith.constant 0 : index
    %40 = vector.load %arg7[%39, %c0_18] : memref<8x128xf32, #tpu.memory_space<vmem>>, vector<1x128xf32>
    tpu.vector_store %arg7[%39, %c0_18], %38 {strides = array<i32>} : memref<8x128xf32, #tpu.memory_space<vmem>>, vector<1x128xf32>,
    %c1_i32 = arith.constant 1 : i32
    %41 = arith.index_cast %c1_i32 : i32 to index
    %c0_19 = arith.constant 0 : index
    %42 = vector.load %arg9[%41, %c0_19] : memref<8x512xf32, #tpu.memory_space<vmem>>, vector<1x512xf32>
    %cst_20 = arith.constant dense<0.000000e+00> : vector<1x512xf32>
    %43 = tpu.matmul %38, %7, %cst_20 {dimension_numbers = #tpu.dot_dimension_numbers<[1], [0], [0], [1], [0, 0, 1, 1], [], []>} : vector<1x128xf32>, vector<128x512xf32>, vector<1x512xf32> -> vector<1x512xf32>
    %44 = arith.addf %42, %43 : vector<1x512xf32>
    %45 = vector.extract_strided_slice %44 {offsets = [0, 0], sizes = [1, 128], strides = [1, 1]} : vector<1x512xf32> to vector<1x128xf32>
    %46 = arith.negf %45 : vector<1x128xf32>
    %47 = math.exp %46 : vector<1x128xf32>
    %cst_21 = arith.constant 1.000000e+00 : f32
    %48 = vector.broadcast %cst_21 : f32 to vector<1x128xf32>
    %49 = arith.addf %48, %47 : vector<1x128xf32>
    %50 = arith.divf %48, %49 : vector<1x128xf32>
    %51 = vector.extract_strided_slice %44 {offsets = [0, 128], sizes = [1, 128], strides = [1, 1]} : vector<1x512xf32> to vector<1x128xf32>
    %52 = arith.negf %51 : vector<1x128xf32>
    %53 = math.exp %52 : vector<1x128xf32>
    %cst_22 = arith.constant 1.000000e+00 : f32
    %54 = vector.broadcast %cst_22 : f32 to vector<1x128xf32>
    %55 = arith.addf %54, %53 : vector<1x128xf32>
    %56 = arith.divf %54, %55 : vector<1x128xf32>
    %57 = vector.extract_strided_slice %44 {offsets = [0, 256], sizes = [1, 128], strides = [1, 1]} : vector<1x512xf32> to vector<1x128xf32>
    %58 = math.tanh %57 : vector<1x128xf32>
    %59 = vector.extract_strided_slice %44 {offsets = [0, 384], sizes = [1, 128], strides = [1, 1]} : vector<1x512xf32> to vector<1x128xf32>
    %60 = arith.negf %59 : vector<1x128xf32>
    %61 = math.exp %60 : vector<1x128xf32>
    %cst_23 = arith.constant 1.000000e+00 : f32
    %62 = vector.broadcast %cst_23 : f32 to vector<1x128xf32>
    %63 = arith.addf %62, %61 : vector<1x128xf32>
    %64 = arith.divf %62, %63 : vector<1x128xf32>
    %65 = arith.mulf %56, %36 : vector<1x128xf32>
    %66 = arith.mulf %50, %58 : vector<1x128xf32>
    %67 = arith.addf %65, %66 : vector<1x128xf32>
    %68 = math.tanh %67 : vector<1x128xf32>
    %69 = arith.mulf %64, %68 : vector<1x128xf32>
    %70 = arith.index_cast %c1_i32 : i32 to index
    %c0_24 = arith.constant 0 : index
    %71 = vector.load %arg7[%70, %c0_24] : memref<8x128xf32, #tpu.memory_space<vmem>>, vector<1x128xf32>
    tpu.vector_store %arg7[%70, %c0_24], %69 {strides = array<i32>} : memref<8x128xf32, #tpu.memory_space<vmem>>, vector<1x128xf32>,
    %c2_i32 = arith.constant 2 : i32
    %72 = arith.index_cast %c2_i32 : i32 to index
    %c0_25 = arith.constant 0 : index
    %73 = vector.load %arg9[%72, %c0_25] : memref<8x512xf32, #tpu.memory_space<vmem>>, vector<1x512xf32>
    %cst_26 = arith.constant dense<0.000000e+00> : vector<1x512xf32>
    %74 = tpu.matmul %69, %7, %cst_26 {dimension_numbers = #tpu.dot_dimension_numbers<[1], [0], [0], [1], [0, 0, 1, 1], [], []>} : vector<1x128xf32>, vector<128x512xf32>, vector<1x512xf32> -> vector<1x512xf32>
    %75 = arith.addf %73, %74 : vector<1x512xf32>
    %76 = vector.extract_strided_slice %75 {offsets = [0, 0], sizes = [1, 128], strides = [1, 1]} : vector<1x512xf32> to vector<1x128xf32>
    %77 = arith.negf %76 : vector<1x128xf32>
    %78 = math.exp %77 : vector<1x128xf32>
    %cst_27 = arith.constant 1.000000e+00 : f32
    %79 = vector.broadcast %cst_27 : f32 to vector<1x128xf32>
    %80 = arith.addf %79, %78 : vector<1x128xf32>
    %81 = arith.divf %79, %80 : vector<1x128xf32>
    %82 = vector.extract_strided_slice %75 {offsets = [0, 128], sizes = [1, 128], strides = [1, 1]} : vector<1x512xf32> to vector<1x128xf32>
    %83 = arith.negf %82 : vector<1x128xf32>
    %84 = math.exp %83 : vector<1x128xf32>
    %cst_28 = arith.constant 1.000000e+00 : f32
    %85 = vector.broadcast %cst_28 : f32 to vector<1x128xf32>
    %86 = arith.addf %85, %84 : vector<1x128xf32>
    %87 = arith.divf %85, %86 : vector<1x128xf32>
    %88 = vector.extract_strided_slice %75 {offsets = [0, 256], sizes = [1, 128], strides = [1, 1]} : vector<1x512xf32> to vector<1x128xf32>
    %89 = math.tanh %88 : vector<1x128xf32>
    %90 = vector.extract_strided_slice %75 {offsets = [0, 384], sizes = [1, 128], strides = [1, 1]} : vector<1x512xf32> to vector<1x128xf32>
    %91 = arith.negf %90 : vector<1x128xf32>
    %92 = math.exp %91 : vector<1x128xf32>
    %cst_29 = arith.constant 1.000000e+00 : f32
    %93 = vector.broadcast %cst_29 : f32 to vector<1x128xf32>
    %94 = arith.addf %93, %92 : vector<1x128xf32>
    %95 = arith.divf %93, %94 : vector<1x128xf32>
    %96 = arith.mulf %87, %67 : vector<1x128xf32>
    %97 = arith.mulf %81, %89 : vector<1x128xf32>
    %98 = arith.addf %96, %97 : vector<1x128xf32>
    %99 = math.tanh %98 : vector<1x128xf32>
    %100 = arith.mulf %95, %99 : vector<1x128xf32>
    %101 = arith.index_cast %c2_i32 : i32 to index
    %c0_30 = arith.constant 0 : index
    %102 = vector.load %arg7[%101, %c0_30] : memref<8x128xf32, #tpu.memory_space<vmem>>, vector<1x128xf32>
    tpu.vector_store %arg7[%101, %c0_30], %100 {strides = array<i32>} : memref<8x128xf32, #tpu.memory_space<vmem>>, vector<1x128xf32>,
    %c3_i32 = arith.constant 3 : i32
    %103 = arith.index_cast %c3_i32 : i32 to index
    %c0_31 = arith.constant 0 : index
    %104 = vector.load %arg9[%103, %c0_31] : memref<8x512xf32, #tpu.memory_space<vmem>>, vector<1x512xf32>
    %cst_32 = arith.constant dense<0.000000e+00> : vector<1x512xf32>
    %105 = tpu.matmul %100, %7, %cst_32 {dimension_numbers = #tpu.dot_dimension_numbers<[1], [0], [0], [1], [0, 0, 1, 1], [], []>} : vector<1x128xf32>, vector<128x512xf32>, vector<1x512xf32> -> vector<1x512xf32>
    %106 = arith.addf %104, %105 : vector<1x512xf32>
    %107 = vector.extract_strided_slice %106 {offsets = [0, 0], sizes = [1, 128], strides = [1, 1]} : vector<1x512xf32> to vector<1x128xf32>
    %108 = arith.negf %107 : vector<1x128xf32>
    %109 = math.exp %108 : vector<1x128xf32>
    %cst_33 = arith.constant 1.000000e+00 : f32
    %110 = vector.broadcast %cst_33 : f32 to vector<1x128xf32>
    %111 = arith.addf %110, %109 : vector<1x128xf32>
    %112 = arith.divf %110, %111 : vector<1x128xf32>
    %113 = vector.extract_strided_slice %106 {offsets = [0, 128], sizes = [1, 128], strides = [1, 1]} : vector<1x512xf32> to vector<1x128xf32>
    %114 = arith.negf %113 : vector<1x128xf32>
    %115 = math.exp %114 : vector<1x128xf32>
    %cst_34 = arith.constant 1.000000e+00 : f32
    %116 = vector.broadcast %cst_34 : f32 to vector<1x128xf32>
    %117 = arith.addf %116, %115 : vector<1x128xf32>
    %118 = arith.divf %116, %117 : vector<1x128xf32>
    %119 = vector.extract_strided_slice %106 {offsets = [0, 256], sizes = [1, 128], strides = [1, 1]} : vector<1x512xf32> to vector<1x128xf32>
    %120 = math.tanh %119 : vector<1x128xf32>
    %121 = vector.extract_strided_slice %106 {offsets = [0, 384], sizes = [1, 128], strides = [1, 1]} : vector<1x512xf32> to vector<1x128xf32>
    %122 = arith.negf %121 : vector<1x128xf32>
    %123 = math.exp %122 : vector<1x128xf32>
    %cst_35 = arith.constant 1.000000e+00 : f32
    %124 = vector.broadcast %cst_35 : f32 to vector<1x128xf32>
    %125 = arith.addf %124, %123 : vector<1x128xf32>
    %126 = arith.divf %124, %125 : vector<1x128xf32>
    %127 = arith.mulf %118, %98 : vector<1x128xf32>
    %128 = arith.mulf %112, %120 : vector<1x128xf32>
    %129 = arith.addf %127, %128 : vector<1x128xf32>
    %130 = math.tanh %129 : vector<1x128xf32>
    %131 = arith.mulf %126, %130 : vector<1x128xf32>
    %132 = arith.index_cast %c3_i32 : i32 to index
    %c0_36 = arith.constant 0 : index
    %133 = vector.load %arg7[%132, %c0_36] : memref<8x128xf32, #tpu.memory_space<vmem>>, vector<1x128xf32>
    tpu.vector_store %arg7[%132, %c0_36], %131 {strides = array<i32>} : memref<8x128xf32, #tpu.memory_space<vmem>>, vector<1x128xf32>,
    %c4_i32 = arith.constant 4 : i32
    %134 = arith.index_cast %c4_i32 : i32 to index
    %c0_37 = arith.constant 0 : index
    %135 = vector.load %arg9[%134, %c0_37] : memref<8x512xf32, #tpu.memory_space<vmem>>, vector<1x512xf32>
    %cst_38 = arith.constant dense<0.000000e+00> : vector<1x512xf32>
    %136 = tpu.matmul %131, %7, %cst_38 {dimension_numbers = #tpu.dot_dimension_numbers<[1], [0], [0], [1], [0, 0, 1, 1], [], []>} : vector<1x128xf32>, vector<128x512xf32>, vector<1x512xf32> -> vector<1x512xf32>
    %137 = arith.addf %135, %136 : vector<1x512xf32>
    %138 = vector.extract_strided_slice %137 {offsets = [0, 0], sizes = [1, 128], strides = [1, 1]} : vector<1x512xf32> to vector<1x128xf32>
    %139 = arith.negf %138 : vector<1x128xf32>
    %140 = math.exp %139 : vector<1x128xf32>
    %cst_39 = arith.constant 1.000000e+00 : f32
    %141 = vector.broadcast %cst_39 : f32 to vector<1x128xf32>
    %142 = arith.addf %141, %140 : vector<1x128xf32>
    %143 = arith.divf %141, %142 : vector<1x128xf32>
    %144 = vector.extract_strided_slice %137 {offsets = [0, 128], sizes = [1, 128], strides = [1, 1]} : vector<1x512xf32> to vector<1x128xf32>
    %145 = arith.negf %144 : vector<1x128xf32>
    %146 = math.exp %145 : vector<1x128xf32>
    %cst_40 = arith.constant 1.000000e+00 : f32
    %147 = vector.broadcast %cst_40 : f32 to vector<1x128xf32>
    %148 = arith.addf %147, %146 : vector<1x128xf32>
    %149 = arith.divf %147, %148 : vector<1x128xf32>
    %150 = vector.extract_strided_slice %137 {offsets = [0, 256], sizes = [1, 128], strides = [1, 1]} : vector<1x512xf32> to vector<1x128xf32>
    %151 = math.tanh %150 : vector<1x128xf32>
    %152 = vector.extract_strided_slice %137 {offsets = [0, 384], sizes = [1, 128], strides = [1, 1]} : vector<1x512xf32> to vector<1x128xf32>
    %153 = arith.negf %152 : vector<1x128xf32>
    %154 = math.exp %153 : vector<1x128xf32>
    %cst_41 = arith.constant 1.000000e+00 : f32
    %155 = vector.broadcast %cst_41 : f32 to vector<1x128xf32>
    %156 = arith.addf %155, %154 : vector<1x128xf32>
    %157 = arith.divf %155, %156 : vector<1x128xf32>
    %158 = arith.mulf %149, %129 : vector<1x128xf32>
    %159 = arith.mulf %143, %151 : vector<1x128xf32>
    %160 = arith.addf %158, %159 : vector<1x128xf32>
    %161 = math.tanh %160 : vector<1x128xf32>
    %162 = arith.mulf %157, %161 : vector<1x128xf32>
    %163 = arith.index_cast %c4_i32 : i32 to index
    %c0_42 = arith.constant 0 : index
    %164 = vector.load %arg7[%163, %c0_42] : memref<8x128xf32, #tpu.memory_space<vmem>>, vector<1x128xf32>
    tpu.vector_store %arg7[%163, %c0_42], %162 {strides = array<i32>} : memref<8x128xf32, #tpu.memory_space<vmem>>, vector<1x128xf32>,
    %c5_i32 = arith.constant 5 : i32
    %165 = arith.index_cast %c5_i32 : i32 to index
    %c0_43 = arith.constant 0 : index
    %166 = vector.load %arg9[%165, %c0_43] : memref<8x512xf32, #tpu.memory_space<vmem>>, vector<1x512xf32>
    %cst_44 = arith.constant dense<0.000000e+00> : vector<1x512xf32>
    %167 = tpu.matmul %162, %7, %cst_44 {dimension_numbers = #tpu.dot_dimension_numbers<[1], [0], [0], [1], [0, 0, 1, 1], [], []>} : vector<1x128xf32>, vector<128x512xf32>, vector<1x512xf32> -> vector<1x512xf32>
    %168 = arith.addf %166, %167 : vector<1x512xf32>
    %169 = vector.extract_strided_slice %168 {offsets = [0, 0], sizes = [1, 128], strides = [1, 1]} : vector<1x512xf32> to vector<1x128xf32>
    %170 = arith.negf %169 : vector<1x128xf32>
    %171 = math.exp %170 : vector<1x128xf32>
    %cst_45 = arith.constant 1.000000e+00 : f32
    %172 = vector.broadcast %cst_45 : f32 to vector<1x128xf32>
    %173 = arith.addf %172, %171 : vector<1x128xf32>
    %174 = arith.divf %172, %173 : vector<1x128xf32>
    %175 = vector.extract_strided_slice %168 {offsets = [0, 128], sizes = [1, 128], strides = [1, 1]} : vector<1x512xf32> to vector<1x128xf32>
    %176 = arith.negf %175 : vector<1x128xf32>
    %177 = math.exp %176 : vector<1x128xf32>
    %cst_46 = arith.constant 1.000000e+00 : f32
    %178 = vector.broadcast %cst_46 : f32 to vector<1x128xf32>
    %179 = arith.addf %178, %177 : vector<1x128xf32>
    %180 = arith.divf %178, %179 : vector<1x128xf32>
    %181 = vector.extract_strided_slice %168 {offsets = [0, 256], sizes = [1, 128], strides = [1, 1]} : vector<1x512xf32> to vector<1x128xf32>
    %182 = math.tanh %181 : vector<1x128xf32>
    %183 = vector.extract_strided_slice %168 {offsets = [0, 384], sizes = [1, 128], strides = [1, 1]} : vector<1x512xf32> to vector<1x128xf32>
    %184 = arith.negf %183 : vector<1x128xf32>
    %185 = math.exp %184 : vector<1x128xf32>
    %cst_47 = arith.constant 1.000000e+00 : f32
    %186 = vector.broadcast %cst_47 : f32 to vector<1x128xf32>
    %187 = arith.addf %186, %185 : vector<1x128xf32>
    %188 = arith.divf %186, %187 : vector<1x128xf32>
    %189 = arith.mulf %180, %160 : vector<1x128xf32>
    %190 = arith.mulf %174, %182 : vector<1x128xf32>
    %191 = arith.addf %189, %190 : vector<1x128xf32>
    %192 = math.tanh %191 : vector<1x128xf32>
    %193 = arith.mulf %188, %192 : vector<1x128xf32>
    %194 = arith.index_cast %c5_i32 : i32 to index
    %c0_48 = arith.constant 0 : index
    %195 = vector.load %arg7[%194, %c0_48] : memref<8x128xf32, #tpu.memory_space<vmem>>, vector<1x128xf32>
    tpu.vector_store %arg7[%194, %c0_48], %193 {strides = array<i32>} : memref<8x128xf32, #tpu.memory_space<vmem>>, vector<1x128xf32>,
    %c6_i32 = arith.constant 6 : i32
    %196 = arith.index_cast %c6_i32 : i32 to index
    %c0_49 = arith.constant 0 : index
    %197 = vector.load %arg9[%196, %c0_49] : memref<8x512xf32, #tpu.memory_space<vmem>>, vector<1x512xf32>
    %cst_50 = arith.constant dense<0.000000e+00> : vector<1x512xf32>
    %198 = tpu.matmul %193, %7, %cst_50 {dimension_numbers = #tpu.dot_dimension_numbers<[1], [0], [0], [1], [0, 0, 1, 1], [], []>} : vector<1x128xf32>, vector<128x512xf32>, vector<1x512xf32> -> vector<1x512xf32>
    %199 = arith.addf %197, %198 : vector<1x512xf32>
    %200 = vector.extract_strided_slice %199 {offsets = [0, 0], sizes = [1, 128], strides = [1, 1]} : vector<1x512xf32> to vector<1x128xf32>
    %201 = arith.negf %200 : vector<1x128xf32>
    %202 = math.exp %201 : vector<1x128xf32>
    %cst_51 = arith.constant 1.000000e+00 : f32
    %203 = vector.broadcast %cst_51 : f32 to vector<1x128xf32>
    %204 = arith.addf %203, %202 : vector<1x128xf32>
    %205 = arith.divf %203, %204 : vector<1x128xf32>
    %206 = vector.extract_strided_slice %199 {offsets = [0, 128], sizes = [1, 128], strides = [1, 1]} : vector<1x512xf32> to vector<1x128xf32>
    %207 = arith.negf %206 : vector<1x128xf32>
    %208 = math.exp %207 : vector<1x128xf32>
    %cst_52 = arith.constant 1.000000e+00 : f32
    %209 = vector.broadcast %cst_52 : f32 to vector<1x128xf32>
    %210 = arith.addf %209, %208 : vector<1x128xf32>
    %211 = arith.divf %209, %210 : vector<1x128xf32>
    %212 = vector.extract_strided_slice %199 {offsets = [0, 256], sizes = [1, 128], strides = [1, 1]} : vector<1x512xf32> to vector<1x128xf32>
    %213 = math.tanh %212 : vector<1x128xf32>
    %214 = vector.extract_strided_slice %199 {offsets = [0, 384], sizes = [1, 128], strides = [1, 1]} : vector<1x512xf32> to vector<1x128xf32>
    %215 = arith.negf %214 : vector<1x128xf32>
    %216 = math.exp %215 : vector<1x128xf32>
    %cst_53 = arith.constant 1.000000e+00 : f32
    %217 = vector.broadcast %cst_53 : f32 to vector<1x128xf32>
    %218 = arith.addf %217, %216 : vector<1x128xf32>
    %219 = arith.divf %217, %218 : vector<1x128xf32>
    %220 = arith.mulf %211, %191 : vector<1x128xf32>
    %221 = arith.mulf %205, %213 : vector<1x128xf32>
    %222 = arith.addf %220, %221 : vector<1x128xf32>
    %223 = math.tanh %222 : vector<1x128xf32>
    %224 = arith.mulf %219, %223 : vector<1x128xf32>
    %225 = arith.index_cast %c6_i32 : i32 to index
    %c0_54 = arith.constant 0 : index
    %226 = vector.load %arg7[%225, %c0_54] : memref<8x128xf32, #tpu.memory_space<vmem>>, vector<1x128xf32>
    tpu.vector_store %arg7[%225, %c0_54], %224 {strides = array<i32>} : memref<8x128xf32, #tpu.memory_space<vmem>>, vector<1x128xf32>,
    %c7_i32 = arith.constant 7 : i32
    %227 = arith.index_cast %c7_i32 : i32 to index
    %c0_55 = arith.constant 0 : index
    %228 = vector.load %arg9[%227, %c0_55] : memref<8x512xf32, #tpu.memory_space<vmem>>, vector<1x512xf32>
    %cst_56 = arith.constant dense<0.000000e+00> : vector<1x512xf32>
    %229 = tpu.matmul %224, %7, %cst_56 {dimension_numbers = #tpu.dot_dimension_numbers<[1], [0], [0], [1], [0, 0, 1, 1], [], []>} : vector<1x128xf32>, vector<128x512xf32>, vector<1x512xf32> -> vector<1x512xf32>
    %230 = arith.addf %228, %229 : vector<1x512xf32>
    %231 = vector.extract_strided_slice %230 {offsets = [0, 0], sizes = [1, 128], strides = [1, 1]} : vector<1x512xf32> to vector<1x128xf32>
    %232 = arith.negf %231 : vector<1x128xf32>
    %233 = math.exp %232 : vector<1x128xf32>
    %cst_57 = arith.constant 1.000000e+00 : f32
    %234 = vector.broadcast %cst_57 : f32 to vector<1x128xf32>
    %235 = arith.addf %234, %233 : vector<1x128xf32>
    %236 = arith.divf %234, %235 : vector<1x128xf32>
    %237 = vector.extract_strided_slice %230 {offsets = [0, 128], sizes = [1, 128], strides = [1, 1]} : vector<1x512xf32> to vector<1x128xf32>
    %238 = arith.negf %237 : vector<1x128xf32>
    %239 = math.exp %238 : vector<1x128xf32>
    %cst_58 = arith.constant 1.000000e+00 : f32
    %240 = vector.broadcast %cst_58 : f32 to vector<1x128xf32>
    %241 = arith.addf %240, %239 : vector<1x128xf32>
    %242 = arith.divf %240, %241 : vector<1x128xf32>
    %243 = vector.extract_strided_slice %230 {offsets = [0, 256], sizes = [1, 128], strides = [1, 1]} : vector<1x512xf32> to vector<1x128xf32>
    %244 = math.tanh %243 : vector<1x128xf32>
    %245 = vector.extract_strided_slice %230 {offsets = [0, 384], sizes = [1, 128], strides = [1, 1]} : vector<1x512xf32> to vector<1x128xf32>
    %246 = arith.negf %245 : vector<1x128xf32>
    %247 = math.exp %246 : vector<1x128xf32>
    %cst_59 = arith.constant 1.000000e+00 : f32
    %248 = vector.broadcast %cst_59 : f32 to vector<1x128xf32>
    %249 = arith.addf %248, %247 : vector<1x128xf32>
    %250 = arith.divf %248, %249 : vector<1x128xf32>
    %251 = arith.mulf %242, %222 : vector<1x128xf32>
    %252 = arith.mulf %236, %244 : vector<1x128xf32>
    %253 = arith.addf %251, %252 : vector<1x128xf32>
    %254 = math.tanh %253 : vector<1x128xf32>
    %255 = arith.mulf %250, %254 : vector<1x128xf32>
    %256 = arith.index_cast %c7_i32 : i32 to index
    %c0_60 = arith.constant 0 : index
    %257 = vector.load %arg7[%256, %c0_60] : memref<8x128xf32, #tpu.memory_space<vmem>>, vector<1x128xf32>
    tpu.vector_store %arg7[%256, %c0_60], %255 {strides = array<i32>} : memref<8x128xf32, #tpu.memory_space<vmem>>, vector<1x128xf32>,
    %c8_i32 = arith.constant 8 : i32
    %c0_61 = arith.constant 0 : index
    %c0_62 = arith.constant 0 : index
    %258 = vector.load %arg8[%c0_61, %c0_62] : memref<1x128xf32, #tpu.memory_space<vmem>>, vector<1x128xf32>
    tpu.vector_store %arg8[%c0_61, %c0_62], %253 {strides = array<i32>} : memref<1x128xf32, #tpu.memory_space<vmem>>, vector<1x128xf32>,
    return
  }
  func.func @transform_0(%arg0: i32) -> (i32, i32) {
    %c0_i32 = arith.constant 0 : i32
    %c0_i32_0 = arith.constant 0 : i32
    %c0_i32_1 = arith.constant 0 : i32
    return %c0_i32, %c0_i32_0 : i32, i32
  }
  func.func @transform_1(%arg0: i32) -> (i32, i32) {
    %c0_i32 = arith.constant 0 : i32
    %c0_i32_0 = arith.constant 0 : i32
    %c0_i32_1 = arith.constant 0 : i32
    return %c0_i32, %c0_i32_0 : i32, i32
  }
  func.func @transform_2(%arg0: i32) -> (i32, i32) {
    %c0_i32 = arith.constant 0 : i32
    %c0_i32_0 = arith.constant 0 : i32
    %c0_i32_1 = arith.constant 0 : i32
    return %c0_i32, %c0_i32_0 : i32, i32
  }
  func.func @transform_3(%arg0: i32) -> (i32, i32) {
    %c0_i32 = arith.constant 0 : i32
    %c0_i32_0 = arith.constant 0 : i32
    %c0_i32_1 = arith.constant 0 : i32
    return %c0_i32, %c0_i32_0 : i32, i32
  }
  func.func @transform_4(%arg0: i32) -> (i32, i32) {
    %c0_i32 = arith.constant 0 : i32
    %c0_i32_0 = arith.constant 0 : i32
    %c0_i32_1 = arith.constant 0 : i32
    return %c0_i32, %c0_i32_0 : i32, i32
  }
  func.func @transform_5(%arg0: i32) -> (i32, i32) {
    %c0_i32 = arith.constant 0 : i32
    %c0_i32_0 = arith.constant 0 : i32
    %c0_i32_1 = arith.constant 0 : i32
    return %c0_i32, %c0_i32_0 : i32, i32
  }
  func.func @transform_6(%arg0: i32) -> (i32, i32) {
    %c0_i32 = arith.constant 0 : i32
    %c0_i32_0 = arith.constant 0 : i32
    %c0_i32_1 = arith.constant 0 : i32
    return %c0_i32, %c0_i32_0 : i32, i32
  }
  func.func @transform_7(%arg0: i32) -> (i32, i32) {
    %c0_i32 = arith.constant 0 : i32
    %c0_i32_0 = arith.constant 0 : i32
    %c0_i32_1 = arith.constant 0 : i32
    return %c0_i32, %c0_i32_0 : i32, i32
  }
}

</mosaic_0001>

<bundles_post_ra>
// kernel: tpu_custom_call.1
= control target key start
LH: loop header
LB: loop body
LE: loop exit
PB: predicated region body
PF: predicated region fallthrough
CT: control target
= control target key end

     0   :  { %13 = vsyncpa [#allocation4], 0  ;;  %s3410_s0 = inlined_call_operand.hbm [shape: f32[8,128], index: 0, kind: input, shape index: {}]   ;;  %s3411_s1 = inlined_call_operand.vmem [shape: f32[1,128], index: 1, kind: input, shape index: {}]   ;;  %s3412_s2 = inlined_call_operand.vmem [shape: f32[1,128], index: 2, kind: input, shape index: {}]   ;;  %s3413_s3 = inlined_call_operand.hbm [shape: f32[128,512], index: 3, kind: input, shape index: {}]   ;;  %s3414_s4 = inlined_call_operand.hbm [shape: f32[128,512], index: 4, kind: input, shape index: {}]   ;;  %s3415_s5 = inlined_call_operand.vmem [shape: f32[1,512], index: 5, kind: input, shape index: {}]   ;;  %s3416_s6 = inlined_call_operand.hbm [shape: f32[8,128], index: 6, kind: output, shape index: {0}]   ;;  %s3417_s7 = inlined_call_operand.hbm [shape: f32[1,128], index: 7, kind: output, shape index: {1}]  }
   0x1   :  { %14 = vsyncpa [#allocation7], 0 }
   0x2   :  { %15 = vsyncpa [#allocation5], 0 }
   0x3   :  { %16 = vsyncpa [#allocation11], 0  ;;  %s2898_s24 = smov [#allocation6]   ;;  %s2780_s28 = scalar_lea.hbm %s3413_s3, 8192 }
   0x4   :  { %s36_s25 = sshll.u32 %s2898_s24, 4  ;;  %p2781_p0 = scmp.ne.s32.totalorder %s3413_s3, %s2780_s28  ;;  %s37_s25 = int_to_ptr.vmem [resolvable:$true] %s36_s25 }
   0x5   :  { %p2784_p1 = scmp.lt.u32.totalorder %s2780_s28, %s3413_s3 }
   0x7   :  { %p2786_p2 = pnand %p2784_p1, %p2781_p0 }
   0x9   :  { %2789 = shalt.err (!%p2786_p2)
}
   0xa   :  { %s2790_s10 = scalar_lea.vmem %s37_s25, 8192  ;;  %p2795_p4 = scmp.lt.s32.totalorder %s37_s25, %s37_s25 }
   0xb   :  { %p2791_p3 = scmp.ne.s32.totalorder %s37_s25, %s2790_s10  ;;  %p2796_p5 = scmp.lt.s32.totalorder %s2790_s10, %s2790_s10 }
   0xd   :  { %p2797_p6 = por %p2796_p5, %p2795_p4 }
   0xf   :  { %p2798_p7 = pnand %p2797_p6, %p2791_p3 }
  0x11   :  { %2801 = shalt.err (!%p2798_p7)
}
  0x12   :  { %s2899_s11 = smov 512   ;;  %s2900_s12 = smov 32  }
  0x13   :  { %42 = dma.hbm_to_vmem [thread:$0]  %s3413_s3, 8192, %s37_s25, [#allocation7], %s2899_s11, %s2899_s11, %s2900_s12  }
  0x14   :  { %s2901_s15 = smov [#allocation3]   ;;  %s2902_s17 = smov [#allocation8]  }
  0x15   :  { %s23_s16 = sshll.u32 %s2901_s15, 4  ;;  %s48_s18 = sshll.u32 %s2902_s17, 4  ;;  %s24_s16 = int_to_ptr.vmem [resolvable:$true] %s23_s16  ;;  %s49_s18 = int_to_ptr.vmem [resolvable:$true] %s48_s18 }
  0x16   :  { %s2802_s21 = scalar_lea.hbm %s3410_s0, 128 }
  0x17   :  { %p2803_p8 = scmp.ne.s32.totalorder %s3410_s0, %s2802_s21  ;;  %p2806_p9 = scmp.lt.u32.totalorder %s2802_s21, %s3410_s0 }
  0x19   :  { %p2808_p10 = pnand %p2806_p9, %p2803_p8 }
  0x1b   :  { %2811 = shalt.err (!%p2808_p10)
}
  0x1c   :  { %s2812_s3 = scalar_lea.vmem %s24_s16, 128  ;;  %p2817_p12 = scmp.lt.s32.totalorder %s24_s16, %s24_s16 }
  0x1d   :  { %p2813_p11 = scmp.ne.s32.totalorder %s24_s16, %s2812_s3  ;;  %p2818_p13 = scmp.lt.s32.totalorder %s2812_s3, %s2812_s3 }
  0x1f   :  { %p2819_p0 = por %p2818_p13, %p2817_p12 }
  0x21   :  { %p2820_p1 = pnand %p2819_p0, %p2813_p11 }
  0x23   :  { %2823 = shalt.err (!%p2820_p1)
}
  0x24   :  { %26 = dma.hbm_to_vmem [thread:$0]  %s3410_s0, 128, %s24_s16, [#allocation4]  }
  0x25   :  { %s2824_s30 = scalar_lea.hbm %s3414_s4, 8192 }
  0x26   :  { %p2825_p2 = scmp.ne.s32.totalorder %s3414_s4, %s2824_s30  ;;  %p2828_p3 = scmp.lt.u32.totalorder %s2824_s30, %s3414_s4 }
  0x28   :  { %p2830_p4 = pnand %p2828_p3, %p2825_p2 }
  0x2a   :  { %2833 = shalt.err (!%p2830_p4)
}
  0x2b   :  { %s2834_s14 = scalar_lea.vmem %s49_s18, 8192  ;;  %p2839_p6 = scmp.lt.s32.totalorder %s49_s18, %s49_s18 }
  0x2c   :  { %p2835_p5 = scmp.ne.s32.totalorder %s49_s18, %s2834_s14  ;;  %p2840_p7 = scmp.lt.s32.totalorder %s2834_s14, %s2834_s14 }
  0x2e   :  { %p2841_p8 = por %p2840_p7, %p2839_p6 }
  0x30   :  { %p2842_p9 = pnand %p2841_p8, %p2835_p5 }
  0x32   :  { %2845 = shalt.err (!%p2842_p9)
}
  0x33   :  { %54 = dma.hbm_to_vmem [thread:$0]  %s3414_s4, 8192, %s49_s18, [#allocation7], %s2899_s11, %s2899_s11, %s2900_s12  }
  0x34   :  { %2890 = dma.done.wait [#allocation4], 128  }
  0x35   :  { %2891 = vsyncadd [#allocation4], 4294967168 }
  0x36   :  { %2892 = dma.done.wait [#allocation7], 16384  }
  0x37   :  { %2893 = vsyncadd [#allocation7], 4294950912  ;;  %v2903_v0 = vmov 0.0   ;;  %v68_v1 = vld [vmem:[#allocation6 + $0x8] sm:$0xff]  ;;  %v70_v3 = vld [vmem:[#allocation6 + $0x18] sm:$0xff] }
  0x38   :  { %217 = vmatprep.mubr.f32.mxu0 %v2903_v0  ;;  %288 = vmatprep.mubr.f32.mxu1 %v2903_v0  ;;  %v72_v2 = vld [vmem:[#allocation6 + $0x28] sm:$0xff]  ;;  %v74_v5 = vld [vmem:[#allocation6 + $0x38] sm:$0xff]  ;;  %v67_v6 = vld [vmem:[#allocation6] sm:$0xff] }
  0x39   :  { %v2067_v4 = vpack.c.bf16 %v72_v2, %v68_v1  ;;  %v71_v7 = vld [vmem:[#allocation6 + $0x20] sm:$0xff]  ;;  %v2099_v8 = vpack.c.bf16 %v74_v5, %v70_v3  ;;  %v69_v10 = vld [vmem:[#allocation6 + $0x10] sm:$0xff]  ;;  %v76_v12 = vld [vmem:[#allocation6 + $0x48] sm:$0xff] }
  0x3a   :  { %v2069_v9 = vpack.c.bf16 %v71_v7, %v67_v6  ;;  %v73_v11 = vld [vmem:[#allocation6 + $0x30] sm:$0xff]  ;;  %v80_v14 = vld [vmem:[#allocation6 + $0x68] sm:$0xff]  ;;  %v78_v15 = vld [vmem:[#allocation6 + $0x58] sm:$0xff] }
  0x3b   :  { %2068 = vmatprep.subr.bf16.mxu0 %v2067_v4  ;;  %v2101_v13 = vpack.c.bf16 %v73_v11, %v69_v10  ;;  %v82_v16 = vld [vmem:[#allocation6 + $0x78] sm:$0xff]  ;;  %2100 = vmatprep.subr.bf16.mxu1 %v2099_v8  ;;  %v2071_v17 = vpack.c.bf16 %v80_v14, %v76_v12  ;;  %v75_v19 = vld [vmem:[#allocation6 + $0x40] sm:$0xff]  ;;  %v77_v21 = vld [vmem:[#allocation6 + $0x50] sm:$0xff] }
  0x3c   :  { %2070 = vmatpush1.bf16.msra.mxu0 %v2069_v9  ;;  %v2103_v18 = vpack.c.bf16 %v82_v16, %v78_v15  ;;  %v79_v20 = vld [vmem:[#allocation6 + $0x60] sm:$0xff]  ;;  %v81_v23 = vld [vmem:[#allocation6 + $0x70] sm:$0xff]  ;;  %v84_v24 = vld [vmem:[#allocation6 + $0x88] sm:$0xff] }
  0x3d   :  { %2102 = vmatpush1.bf16.msra.mxu1 %v2101_v13  ;;  %v2073_v22 = vpack.c.bf16 %v79_v20, %v75_v19  ;;  %v88_v25 = vld [vmem:[#allocation6 + $0xa8] sm:$0xff]  ;;  %2072 = vmatprep.subr.bf16.mxu0 %v2071_v17  ;;  %v2105_v26 = vpack.c.bf16 %v81_v23, %v77_v21  ;;  %v86_v28 = vld [vmem:[#allocation6 + $0x98] sm:$0xff]  ;;  %v83_v30 = vld [vmem:[#allocation6 + $0x80] sm:$0xff] }
  0x3e   :  { %2104 = vmatprep.subr.bf16.mxu1 %v2103_v18  ;;  %v2075_v27 = vpack.c.bf16 %v88_v25, %v84_v24  ;;  %v90_v29 = vld [vmem:[#allocation6 + $0xb8] sm:$0xff]  ;;  %v87_v32 = vld [vmem:[#allocation6 + $0xa0] sm:$0xff]  ;;  %v85_v33 = vld [vmem:[#allocation6 + $0x90] sm:$0xff] }
  0x3f   :  { %v2107_v31 = vpack.c.bf16 %v90_v29, %v86_v28  ;;  %v89_v34 = vld [vmem:[#allocation6 + $0xb0] sm:$0xff]  ;;  %v2077_v35 = vpack.c.bf16 %v87_v32, %v83_v30  ;;  %v92_v36 = vld [vmem:[#allocation6 + $0xc8] sm:$0xff]  ;;  %v94_v38 = vld [vmem:[#allocation6 + $0xd8] sm:$0xff] }
  0x40   :  { %2074 = vmatpush1.bf16.msra.mxu0 %v2073_v22  ;;  %v96_v37 = vld [vmem:[#allocation6 + $0xe8] sm:$0xff]  ;;  %v2109_v39 = vpack.c.bf16 %v89_v34, %v85_v33  ;;  %v98_v41 = vld [vmem:[#allocation6 + $0xf8] sm:$0xff]  ;;  %v91_v42 = vld [vmem:[#allocation6 + $0xc0] sm:$0xff] }
  0x41   :  { %2106 = vmatpush1.bf16.msra.mxu1 %v2105_v26  ;;  %2076 = vmatprep.subr.bf16.mxu0 %v2075_v27  ;;  %v2079_v40 = vpack.c.bf16 %v96_v37, %v92_v36  ;;  %v95_v43 = vld [vmem:[#allocation6 + $0xe0] sm:$0xff]  ;;  %v2111_v44 = vpack.c.bf16 %v98_v41, %v94_v38  ;;  %v93_v45 = vld [vmem:[#allocation6 + $0xd0] sm:$0xff]  ;;  %v100_v47 = vld [vmem:[#allocation6 + $0x108] sm:$0xff] }
  0x42   :  { %2108 = vmatprep.subr.bf16.mxu1 %v2107_v31  ;;  %v97_v46 = vld [vmem:[#allocation6 + $0xf0] sm:$0xff]  ;;  %v104_v48 = vld [vmem:[#allocation6 + $0x128] sm:$0xff]  ;;  %v102_v49 = vld [vmem:[#allocation6 + $0x118] sm:$0xff]  ;;  %v2081_v51 = vpack.c.bf16 %v95_v43, %v91_v42 }
  0x43   :  { %v106_v50 = vld [vmem:[#allocation6 + $0x138] sm:$0xff]  ;;  %v2113_v52 = vpack.c.bf16 %v97_v46, %v93_v45  ;;  %v2083_v53 = vpack.c.bf16 %v104_v48, %v100_v47  ;;  %v99_v54 = vld [vmem:[#allocation6 + $0x100] sm:$0xff]  ;;  %v101_v56 = vld [vmem:[#allocation6 + $0x110] sm:$0xff] }
  0x44   :  { %2078 = vmatpush1.bf16.msra.mxu0 %v2077_v35  ;;  %v103_v55 = vld [vmem:[#allocation6 + $0x120] sm:$0xff]  ;;  %v2115_v57 = vpack.c.bf16 %v106_v50, %v102_v49  ;;  %v105_v58 = vld [vmem:[#allocation6 + $0x130] sm:$0xff]  ;;  %v108_v59 = vld [vmem:[#allocation6 + $0x148] sm:$0xff] }
  0x45   :  { %2110 = vmatpush1.bf16.msra.mxu1 %v2109_v39  ;;  %2080 = vmatprep.subr.bf16.mxu0 %v2079_v40  ;;  %v112_v60 = vld [vmem:[#allocation6 + $0x168] sm:$0xff]  ;;  %v110_v61 = vld [vmem:[#allocation6 + $0x158] sm:$0xff]  ;;  %v2085_v63 = vpack.c.bf16 %v103_v55, %v99_v54  ;;  %v2117_v1 = vpack.c.bf16 %v105_v58, %v101_v56  ;;  %v107_v3 = vld [vmem:[#allocation6 + $0x140] sm:$0xff] }
  0x46   :  { %2112 = vmatprep.subr.bf16.mxu1 %v2111_v44  ;;  %v114_v62 = vld [vmem:[#allocation6 + $0x178] sm:$0xff]  ;;  %v2087_v2 = vpack.c.bf16 %v112_v60, %v108_v59  ;;  %v111_v4 = vld [vmem:[#allocation6 + $0x160] sm:$0xff]  ;;  %v109_v5 = vld [vmem:[#allocation6 + $0x150] sm:$0xff] }
  0x47   :  { %v2119_v6 = vpack.c.bf16 %v114_v62, %v110_v61  ;;  %v113_v7 = vld [vmem:[#allocation6 + $0x170] sm:$0xff]  ;;  %v116_v8 = vld [vmem:[#allocation6 + $0x188] sm:$0xff]  ;;  %v118_v10 = vld [vmem:[#allocation6 + $0x198] sm:$0xff]  ;;  %v2089_v12 = vpack.c.bf16 %v111_v4, %v107_v3 }
  0x48   :  { %2082 = vmatpush1.bf16.msra.mxu0 %v2081_v51  ;;  %v120_v9 = vld [vmem:[#allocation6 + $0x1a8] sm:$0xff]  ;;  %v122_v11 = vld [vmem:[#allocation6 + $0x1b8] sm:$0xff]  ;;  %v2121_v13 = vpack.c.bf16 %v113_v7, %v109_v5  ;;  %v115_v15 = vld [vmem:[#allocation6 + $0x180] sm:$0xff] }
  0x49   :  { %2114 = vmatpush1.bf16.msra.mxu1 %v2113_v52  ;;  %2084 = vmatprep.subr.bf16.mxu0 %v2083_v53  ;;  %v2091_v14 = vpack.c.bf16 %v120_v9, %v116_v8  ;;  %v119_v16 = vld [vmem:[#allocation6 + $0x1a0] sm:$0xff]  ;;  %v117_v17 = vld [vmem:[#allocation6 + $0x190] sm:$0xff]  ;;  %v2123_v18 = vpack.c.bf16 %v122_v11, %v118_v10  ;;  %v124_v20 = vld [vmem:[#allocation6 + $0x1c8] sm:$0xff] }
  0x4a   :  { %2116 = vmatprep.subr.bf16.mxu1 %v2115_v57  ;;  %v121_v19 = vld [vmem:[#allocation6 + $0x1b0] sm:$0xff]  ;;  %v128_v21 = vld [vmem:[#allocation6 + $0x1e8] sm:$0xff]  ;;  %v126_v22 = vld [vmem:[#allocation6 + $0x1d8] sm:$0xff]  ;;  %v2093_v24 = vpack.c.bf16 %v119_v16, %v115_v15 }
  0x4b   :  { %v130_v23 = vld [vmem:[#allocation6 + $0x1f8] sm:$0xff]  ;;  %v2125_v25 = vpack.c.bf16 %v121_v19, %v117_v17  ;;  %v2095_v26 = vpack.c.bf16 %v128_v21, %v124_v20  ;;  %v123_v27 = vld [vmem:[#allocation6 + $0x1c0] sm:$0xff]  ;;  %v125_v29 = vld [vmem:[#allocation6 + $0x1d0] sm:$0xff] }
  0x4c   :  { %2086 = vmatpush1.bf16.msra.mxu0 %v2085_v63  ;;  %v127_v28 = vld [vmem:[#allocation6 + $0x1e0] sm:$0xff]  ;;  %v2127_v30 = vpack.c.bf16 %v130_v23, %v126_v22  ;;  %v129_v31 = vld [vmem:[#allocation6 + $0x1f0] sm:$0xff]  ;;  %v300_v32 = vld [vmem:[#allocation8 + $0x8] sm:$0xff] }
  0x4d   :  { %2118 = vmatpush1.bf16.msra.mxu1 %v2117_v1  ;;  %2088 = vmatprep.subr.bf16.mxu0 %v2087_v2  ;;  %v304_v33 = vld [vmem:[#allocation8 + $0x28] sm:$0xff]  ;;  %v302_v34 = vld [vmem:[#allocation8 + $0x18] sm:$0xff]  ;;  %v2097_v36 = vpack.c.bf16 %v127_v28, %v123_v27  ;;  %v2129_v37 = vpack.c.bf16 %v129_v31, %v125_v29  ;;  %v299_v39 = vld [vmem:[#allocation8] sm:$0xff] }
  0x4e   :  { %2120 = vmatprep.subr.bf16.mxu1 %v2119_v6  ;;  %v306_v35 = vld [vmem:[#allocation8 + $0x38] sm:$0xff]  ;;  %v2991_v38 = vpack.c.bf16 %v304_v33, %v300_v32  ;;  %v303_v40 = vld [vmem:[#allocation8 + $0x20] sm:$0xff]  ;;  %v301_v41 = vld [vmem:[#allocation8 + $0x10] sm:$0xff] }
  0x4f   :  { %v2993_v42 = vpack.c.bf16 %v306_v35, %v302_v34  ;;  %v305_v43 = vld [vmem:[#allocation8 + $0x30] sm:$0xff]  ;;  %v308_v44 = vld [vmem:[#allocation8 + $0x48] sm:$0xff]  ;;  %v310_v46 = vld [vmem:[#allocation8 + $0x58] sm:$0xff]  ;;  %v2995_v49 = vpack.c.bf16 %v303_v40, %v299_v39 }
  0x50   :  { %2090 = vmatpush1.bf16.msra.mxu0 %v2089_v12  ;;  %v312_v45 = vld [vmem:[#allocation8 + $0x68] sm:$0xff]  ;;  %v314_v47 = vld [vmem:[#allocation8 + $0x78] sm:$0xff]  ;;  %v2998_v50 = vpack.c.bf16 %v305_v43, %v301_v41  ;;  %v307_v52 = vld [vmem:[#allocation8 + $0x40] sm:$0xff] }
  0x51   :  { %2122 = vmatpush1.bf16.msra.mxu1 %v2121_v13  ;;  %2092 = vmatprep.subr.bf16.mxu0 %v2091_v14  ;;  %v66_v48 = vld [vmem:[#allocation3] sm:$0xff]  ;;  %v3000_v51 = vpack.c.bf16 %v312_v45, %v308_v44  ;;  %v311_v53 = vld [vmem:[#allocation8 + $0x60] sm:$0xff]  ;;  %v309_v54 = vld [vmem:[#allocation8 + $0x50] sm:$0xff]  ;;  %v3003_v55 = vpack.c.bf16 %v314_v47, %v310_v46 }
  0x52   :  { %2124 = vmatprep.subr.bf16.mxu1 %v2123_v18  ;;  %v313_v56 = vld [vmem:[#allocation8 + $0x70] sm:$0xff]  ;;  %v316_v57 = vld [vmem:[#allocation8 + $0x88] sm:$0xff]  ;;  %v318_v59 = vld [vmem:[#allocation8 + $0x98] sm:$0xff]  ;;  %v3006_v61 = vpack.c.bf16 %v311_v53, %v307_v52 }
  0x53   :  { %v320_v58 = vld [vmem:[#allocation8 + $0xa8] sm:$0xff]  ;;  %v322_v60 = vld [vmem:[#allocation8 + $0xb8] sm:$0xff]  ;;  %v3010_v62 = vpack.c.bf16 %v313_v56, %v309_v54  ;;  %v315_v1 = vld [vmem:[#allocation8 + $0x80] sm:$0xff] }
  0x54   :  { %2094 = vmatpush1.bf16.msra.mxu0 %v2093_v24  ;;  %v3012_v63 = vpack.c.bf16 %v320_v58, %v316_v57  ;;  %v319_v2 = vld [vmem:[#allocation8 + $0xa0] sm:$0xff]  ;;  %v317_v3 = vld [vmem:[#allocation8 + $0x90] sm:$0xff]  ;;  %v3015_v4 = vpack.c.bf16 %v322_v60, %v318_v59  ;;  %v324_v6 = vld [vmem:[#allocation8 + $0xc8] sm:$0xff] }
  0x55   :  { %2126 = vmatpush1.bf16.msra.mxu1 %v2125_v25  ;;  %2096 = vmatprep.subr.bf16.mxu0 %v2095_v26  ;;  %v321_v5 = vld [vmem:[#allocation8 + $0xb0] sm:$0xff]  ;;  %v328_v7 = vld [vmem:[#allocation8 + $0xe8] sm:$0xff]  ;;  %v326_v8 = vld [vmem:[#allocation8 + $0xd8] sm:$0xff]  ;;  %v3020_v10 = vpack.c.bf16 %v319_v2, %v315_v1 }
  0x56   :  { %2128 = vmatprep.subr.bf16.mxu1 %v2127_v30  ;;  %v330_v9 = vld [vmem:[#allocation8 + $0xf8] sm:$0xff]  ;;  %v3024_v11 = vpack.c.bf16 %v321_v5, %v317_v3  ;;  %v3026_v12 = vpack.c.bf16 %v328_v7, %v324_v6  ;;  %v323_v13 = vld [vmem:[#allocation8 + $0xc0] sm:$0xff]  ;;  %v325_v15 = vld [vmem:[#allocation8 + $0xd0] sm:$0xff] }
  0x57   :  { %v327_v14 = vld [vmem:[#allocation8 + $0xe0] sm:$0xff]  ;;  %v3029_v16 = vpack.c.bf16 %v330_v9, %v326_v8  ;;  %v329_v17 = vld [vmem:[#allocation8 + $0xf0] sm:$0xff]  ;;  %v332_v18 = vld [vmem:[#allocation8 + $0x108] sm:$0xff] }
  0x58   :  { %2098 = vmatpush1.bf16.msra.mxu0 %v2097_v36  ;;  %v336_v19 = vld [vmem:[#allocation8 + $0x128] sm:$0xff]  ;;  %v334_v20 = vld [vmem:[#allocation8 + $0x118] sm:$0xff]  ;;  %v3032_v22 = vpack.c.bf16 %v327_v14, %v323_v13  ;;  %v3036_v23 = vpack.c.bf16 %v329_v17, %v325_v15  ;;  %v331_v25 = vld [vmem:[#allocation8 + $0x100] sm:$0xff] }
  0x59   :  { %2130 = vmatpush1.bf16.msra.mxu1 %v2129_v37  ;;  %2132 = vmatprep.subr.bf16.mxu0 %v2991_v38  ;;  %v338_v21 = vld [vmem:[#allocation8 + $0x138] sm:$0xff]  ;;  %v3038_v24 = vpack.c.bf16 %v336_v19, %v332_v18  ;;  %v335_v26 = vld [vmem:[#allocation8 + $0x120] sm:$0xff]  ;;  %v333_v27 = vld [vmem:[#allocation8 + $0x110] sm:$0xff] }
  0x5a   :  { %2164 = vmatprep.subr.bf16.mxu1 %v2993_v42  ;;  %v3041_v28 = vpack.c.bf16 %v338_v21, %v334_v20  ;;  %v337_v29 = vld [vmem:[#allocation8 + $0x130] sm:$0xff]  ;;  %v340_v30 = vld [vmem:[#allocation8 + $0x148] sm:$0xff]  ;;  %v342_v32 = vld [vmem:[#allocation8 + $0x158] sm:$0xff]  ;;  %v3044_v34 = vpack.c.bf16 %v335_v26, %v331_v25  ;;  %v133_v20 = vlaneseq }
  0x5b   :  { %218 = vmatmul.mubr.f32.vlgmr.msra.gmra.mrb[0].mxu0 %v66_v48  ;;  %v344_v31 = vld [vmem:[#allocation8 + $0x168] sm:$0xff]  ;;  %v346_v33 = vld [vmem:[#allocation8 + $0x178] sm:$0xff]  ;;  %v3048_v35 = vpack.c.bf16 %v337_v29, %v333_v27  ;;  %v339_v37 = vld [vmem:[#allocation8 + $0x140] sm:$0xff] }
  0x5c   :  { %289 = vmatmul.mubr.f32.vlgmr.msra.gmra.mrb[0].mxu1 %v66_v48  ;;  %2134 = vmatpush1.bf16.msra.mxu0 %v2995_v49  ;;  %v3050_v36 = vpack.c.bf16 %v344_v31, %v340_v30  ;;  %v343_v39 = vld [vmem:[#allocation8 + $0x160] sm:$0xff]  ;;  %v341_v40 = vld [vmem:[#allocation8 + $0x150] sm:$0xff]  ;;  %v3053_v41 = vpack.c.bf16 %v346_v33, %v342_v32  ;;  %v348_v44 = vld [vmem:[#allocation8 + $0x188] sm:$0xff]  ;;  %v134_v21 = vshrl.u32 %v133_v20, 7 }
  0x5d   :  { %2166 = vmatpush1.bf16.msra.mxu1 %v2998_v50  ;;  %2136 = vmatprep.subr.bf16.mxu0 %v3000_v51  ;;  %v345_v43 = vld [vmem:[#allocation8 + $0x170] sm:$0xff]  ;;  %v352_v45 = vld [vmem:[#allocation8 + $0x1a8] sm:$0xff]  ;;  %v350_v46 = vld [vmem:[#allocation8 + $0x198] sm:$0xff]  ;;  %v3056_v48 = vpack.c.bf16 %v343_v39, %v339_v37 }
  0x5e   :  { %2168 = vmatprep.subr.bf16.mxu1 %v3003_v55  ;;  %430 = vmatprep.mubr.f32.mxu0 %v2903_v0  ;;  %v354_v47 = vld [vmem:[#allocation8 + $0x1b8] sm:$0xff]  ;;  %v3060_v52 = vpack.c.bf16 %v345_v43, %v341_v40  ;;  %v3062_v53 = vpack.c.bf16 %v352_v45, %v348_v44  ;;  %v347_v54 = vld [vmem:[#allocation8 + $0x180] sm:$0xff]  ;;  %v349_v57 = vld [vmem:[#allocation8 + $0x190] sm:$0xff]  ;;  %v135_v25 = vsub.s32 0, %v134_v21  ;;  %v143_v27 = vsub.s32 2, %v134_v21 }
  0x5f   :  { %501 = vmatprep.mubr.f32.mxu1 %v2903_v0  ;;  %v351_v56 = vld [vmem:[#allocation8 + $0x1a0] sm:$0xff]  ;;  %v3065_v58 = vpack.c.bf16 %v354_v47, %v350_v46  ;;  %v353_v59 = vld [vmem:[#allocation8 + $0x1b0] sm:$0xff]  ;;  %v356_v60 = vld [vmem:[#allocation8 + $0x1c8] sm:$0xff]  ;;  %v139_v29 = vsub.s32 1, %v134_v21  ;;  %v147_v30 = vsub.s32 3, %v134_v21 }
  0x60   :  { %2138 = vmatpush1.bf16.msra.mxu0 %v3006_v61  ;;  %v360_v1 = vld [vmem:[#allocation8 + $0x1e8] sm:$0xff]  ;;  %v358_v2 = vld [vmem:[#allocation8 + $0x1d8] sm:$0xff]  ;;  %v3068_v5 = vpack.c.bf16 %v351_v56, %v347_v54  ;;  %v3072_v6 = vpack.c.bf16 %v353_v59, %v349_v57  ;;  %v355_v8 = vld [vmem:[#allocation8 + $0x1c0] sm:$0xff]  ;;  %v2904_v56 = vmov 1966171168  }
  0x61   :  { %2170 = vmatpush1.bf16.msra.mxu1 %v3010_v62  ;;  %2140 = vmatprep.subr.bf16.mxu0 %v3012_v63  ;;  %v362_v3 = vld [vmem:[#allocation8 + $0x1f8] sm:$0xff]  ;;  %v3074_v7 = vpack.c.bf16 %v360_v1, %v356_v60  ;;  %v359_v9 = vld [vmem:[#allocation8 + $0x1e0] sm:$0xff]  ;;  %v357_v14 = vld [vmem:[#allocation8 + $0x1d0] sm:$0xff]  ;;  %v515_v57 = vunpack.c.l.s4 %v2904_v56 }
  0x62   :  { %2172 = vmatprep.subr.bf16.mxu1 %v3015_v4  ;;  %v3077_v13 = vpack.c.bf16 %v362_v3, %v358_v2  ;;  %v361_v15 = vld [vmem:[#allocation8 + $0x1f0] sm:$0xff]  ;;  %v3080_v17 = vpack.c.bf16 %v359_v9, %v355_v8  ;;  %v363_v19 = vld [vmem:[%s3411_s1] sm:$0x1] }
  0x63   :  { %v3084_v18 = vpack.c.bf16 %v361_v15, %v357_v14  ;;  %v131_v26 = vld [vmem:[%s3415_s5] sm:$0xf]  ;;  %v516_v59 = vunpack.c.0.s8 %v515_v57 }
  0x64   :  { %2142 = vmatpush1.bf16.msra.mxu0 %v3020_v10  ;;  %v136_v31 = vrot.slane %v131_v26, %v135_v25  ;;  %v144_v32 = vrot.slane %v131_v26, %v143_v27  ;;  %v140_v33 = vrot.slane %v131_v26, %v139_v29  ;;  %v148_v37 = vrot.slane %v131_v26, %v147_v30 }
  0x65   :  { %2174 = vmatpush1.bf16.msra.mxu1 %v3024_v11  ;;  %2144 = vmatprep.subr.bf16.mxu0 %v3026_v12  ;;  %v3131_v60 = vsub.s32 %v516_v59, %v134_v21 }
  0x66   :  { %2176 = vmatprep.subr.bf16.mxu1 %v3029_v16 }
  0x68   :  { %2146 = vmatpush1.bf16.msra.mxu0 %v3032_v22 }
  0x69   :  { %2178 = vmatpush1.bf16.msra.mxu1 %v3036_v23  ;;  %2148 = vmatprep.subr.bf16.mxu0 %v3038_v24 }
  0x6a   :  { %2180 = vmatprep.subr.bf16.mxu1 %v3041_v28 }
  0x6c   :  { %2150 = vmatpush1.bf16.msra.mxu0 %v3044_v34 }
  0x6d   :  { %2182 = vmatpush1.bf16.msra.mxu1 %v3048_v35  ;;  %2152 = vmatprep.subr.bf16.mxu0 %v3050_v36 }
  0x6e   :  { %2184 = vmatprep.subr.bf16.mxu1 %v3053_v41 }
  0x70   :  { %2154 = vmatpush1.bf16.msra.mxu0 %v3056_v48 }
  0x71   :  { %2186 = vmatpush1.bf16.msra.mxu1 %v3060_v52  ;;  %2156 = vmatprep.subr.bf16.mxu0 %v3062_v53 }
  0x72   :  { %2188 = vmatprep.subr.bf16.mxu1 %v3065_v58 }
  0x74   :  { %2158 = vmatpush1.bf16.msra.mxu0 %v3068_v5 }
  0x75   :  { %2190 = vmatpush1.bf16.msra.mxu1 %v3072_v6  ;;  %2160 = vmatprep.subr.bf16.mxu0 %v3074_v7 }
  0x76   :  { %2192 = vmatprep.subr.bf16.mxu1 %v3077_v13 }
  0x78   :  { %2162 = vmatpush1.bf16.msra.mxu0 %v3080_v17 }
  0x79   :  { %2194 = vmatpush1.bf16.msra.mxu1 %v3084_v18  ;;  %2196 = vmatprep.subr.bf16.mxu0 %v2991_v38 }
  0x7a   :  { %2228 = vmatprep.subr.bf16.mxu1 %v2993_v42 }
  0x7b   :  { %431 = vmatmul.mubr.f32.vlgmr.msra.gmra.mrb[2].mxu0 %v363_v19 }
  0x7c   :  { %502 = vmatmul.mubr.f32.vlgmr.msra.gmra.mrb[2].mxu1 %v363_v19  ;;  %2198 = vmatpush1.bf16.msra.mxu0 %v2995_v49 }
  0x7d   :  { %2230 = vmatpush1.bf16.msra.mxu1 %v2998_v50  ;;  %2200 = vmatprep.subr.bf16.mxu0 %v3000_v51 }
  0x7e   :  { %2232 = vmatprep.subr.bf16.mxu1 %v3003_v55  ;;  %636 = vmatprep.mubr.f32.mxu0 %v2903_v0 }
  0x7f   :  { %707 = vmatprep.mubr.f32.mxu1 %v2903_v0 }
  0x80   :  { %2202 = vmatpush1.bf16.msra.mxu0 %v3006_v61 }
  0x81   :  { %2234 = vmatpush1.bf16.msra.mxu1 %v3010_v62  ;;  %2204 = vmatprep.subr.bf16.mxu0 %v3012_v63 }
  0x82   :  { %2236 = vmatprep.subr.bf16.mxu1 %v3015_v4 }
  0x84   :  { %2206 = vmatpush1.bf16.msra.mxu0 %v3020_v10 }
  0x85   :  { %2238 = vmatpush1.bf16.msra.mxu1 %v3024_v11  ;;  %2208 = vmatprep.subr.bf16.mxu0 %v3026_v12 }
  0x86   :  { %2240 = vmatprep.subr.bf16.mxu1 %v3029_v16 }
  0x88   :  { %2210 = vmatpush1.bf16.msra.mxu0 %v3032_v22 }
  0x89   :  { %2242 = vmatpush1.bf16.msra.mxu1 %v3036_v23  ;;  %2212 = vmatprep.subr.bf16.mxu0 %v3038_v24 }
  0x8a   :  { %2244 = vmatprep.subr.bf16.mxu1 %v3041_v28 }
  0x8c   :  { %2214 = vmatpush1.bf16.msra.mxu0 %v3044_v34 }
  0x8d   :  { %2246 = vmatpush1.bf16.msra.mxu1 %v3048_v35  ;;  %2216 = vmatprep.subr.bf16.mxu0 %v3050_v36 }
  0x8e   :  { %2248 = vmatprep.subr.bf16.mxu1 %v3053_v41 }
  0x90   :  { %2218 = vmatpush1.bf16.msra.mxu0 %v3056_v48 }
  0x91   :  { %2250 = vmatpush1.bf16.msra.mxu1 %v3060_v52  ;;  %2220 = vmatprep.subr.bf16.mxu0 %v3062_v53 }
  0x92   :  { %2252 = vmatprep.subr.bf16.mxu1 %v3065_v58 }
  0x94   :  { %2222 = vmatpush1.bf16.msra.mxu0 %v3068_v5 }
  0x95   :  { %2254 = vmatpush1.bf16.msra.mxu1 %v3072_v6  ;;  %2224 = vmatprep.subr.bf16.mxu0 %v3074_v7 }
  0x96   :  { %2256 = vmatprep.subr.bf16.mxu1 %v3077_v13 }
  0x98   :  { %2226 = vmatpush1.bf16.msra.mxu0 %v3080_v17 }
  0x99   :  { %2258 = vmatpush1.bf16.msra.mxu1 %v3084_v18  ;;  %2260 = vmatprep.subr.bf16.mxu0 %v2991_v38 }
  0x9a   :  { %2292 = vmatprep.subr.bf16.mxu1 %v2993_v42 }
 0x12e   :  { %v219_v39 = vpop.f32.mrb[0].mxu0 }
 0x12f   :  { %v220_v40 = vadd.f32 %v219_v39, %v136_v31  ;;  %v290_v43 = vpop.f32.mrb[0].mxu1  ;;  %v221_v44 = vpop.f32.mrb[1].mxu0 }
 0x130   :  { %v291_v45 = vadd.f32 %v290_v43, %v144_v32  ;;  %v222_v46 = vadd.f32 %v221_v44, %v140_v33  ;;  %v292_v47 = vpop.f32.mrb[1].mxu1 }
 0x131   :  { %295 = vst [vmem:[#allocation2] sm:$0xff] %v220_v40  ;;  %v293_v54 = vadd.f32 %v292_v47, %v148_v37 }
 0x132   :  { %297 = vst [vmem:[#allocation2 + $0x10] sm:$0xff] %v291_v45  ;;  %296 = vst [vmem:[#allocation2 + $0x8] sm:$0xff] %v222_v46  ;;  %v364_v46 = vld [vmem:[%s3412_s2] sm:$0x1]  ;;  %s2905_s2 = smov [#allocation10]  }
 0x133   :  { %298 = vst [vmem:[#allocation2 + $0x18] sm:$0xff] %v293_v54  ;;  %s2029_s17 = sshll.u32 %s2905_s2, 4  ;;  %s2030_s17 = int_to_ptr.vmem [resolvable:$true] %s2029_s17 }
 0x134   :  { %s2846_s18 = scalar_lea.vmem %s2030_s17, 16  ;;  %s2850_s19 = scalar_lea.vmem %s2030_s17, 32 }
 0x135   :  { %p2847_p10 = scmp.ne.s32.totalorder %s2030_s17, %s2846_s18  ;;  %p2851_p11 = scmp.lt.s32.totalorder %s2030_s17, %s2030_s17 }
 0x136   :  { %p2852_p12 = scmp.lt.s32.totalorder %s2850_s19, %s2846_s18 }
 0x138   :  { %p2853_p13 = por %p2852_p12, %p2851_p11 }
 0x13a   :  { %v365_v26 = vld [vmem:[#allocation2] ss:$8 sm:$0xf]  ;;  %p2854_p0 = pnand %p2853_p13, %p2847_p10 }
 0x14e   :  { %v432_v1 = vpop.f32.mrb[2].mxu0 }
 0x14f   :  { %v503_v2 = vpop.f32.mrb[2].mxu1  ;;  %v434_v3 = vpop.f32.mrb[3].mxu0 }
 0x150   :  { %v512_v8 = vcombine.low %v432_v1, %v434_v3  ;;  %v505_v9 = vpop.f32.mrb[3].mxu1 }
 0x151   :  { %v513_v14 = vcombine.low %v503_v2, %v505_v9 }
 0x152   :  { %v520_v15 = vrot.slane %v512_v8, %v3131_v60 }
 0x153   :  { %v527_v19 = vrot.slane %v513_v14, %v3131_v60 }
 0x155   :  { %v528_v20 = vcombine.low %v520_v15, %v527_v19 }
 0x157   :  { %v535_v25 = vrot.slane %v528_v20, %v3131_v60 }
 0x159   :  { %v537_v27 = vadd.f32 %v535_v25, %v365_v26 }
 0x15b   :  { %v2043_v29 = vmul.f32 -1.442695, %v537_v27  ;;  %v545_v30 = vrot.slane %v537_v27, 1  ;;  %v556_v31 = vrot.slane %v537_v27, 3  ;;  %v553_v37 = vrot.slane %v537_v27, 2 }
 0x15d   :  { %2652 = vpow2.f32 %v2043_v29  ;;  %v2044_v21 = vmul.f32 -1.442695, %v545_v30  ;;  %v2045_v32 = vmul.f32 -1.442695, %v556_v31 }
 0x15f   :  { %2654 = vpow2.f32 %v2044_v21  ;;  %v571_v21 = vld [vmem:[#allocation2 + $0x1] ss:$8 sm:$0xf] }
 0x160   :  { %2656 = vpow2.f32 %v2045_v32 }
 0x167   :  { %v2653_v33 = vpop.eup %2652 }
 0x168   :  { %v541_v39 = vadd.f32 1.0, %v2653_v33 }
 0x169   :  { %v2655_v40 = vpop.eup %2654 }
 0x16a   :  { %2658 = vrcp.f32 %v541_v39  ;;  %v550_v43 = vadd.f32 1.0, %v2655_v40  ;;  %v2657_v44 = vpop.eup %2656 }
 0x16b   :  { %2660 = vtanh.f32 %v553_v37  ;;  %v561_v56 = vadd.f32 1.0, %v2657_v44 }
 0x16c   :  { %2662 = vrcp.f32 %v550_v43 }
 0x16d   :  { %2664 = vrcp.f32 %v561_v56 }
 0x174   :  { %v2659_v45 = vpop.eup %2658 }
 0x175   :  { %v2661_v47 = vpop.eup %2660 }
 0x176   :  { %v2663_v54 = vpop.eup %2662  ;;  %v565_v59 = vmul.f32 %v2661_v47, %v2659_v45 }
 0x177   :  { %v564_v57 = vmul.f32 %v2663_v54, %v364_v46  ;;  %v2665_v2 = vpop.eup %2664 }
 0x179   :  { %v3139_v1 = vadd.f32 %v565_v59, %v564_v57 }
 0x17b   :  { %2666 = vtanh.f32 %v3139_v1 }
 0x185   :  { %v2667_v3 = vpop.eup %2666 }
 0x186   :  { %v568_v8 = vmul.f32 %v2667_v3, %v2665_v2 }
 0x188   :  { %569 = vst [vmem:[#allocation9] sm:$0x1] %v568_v8  ;;  %637 = vmatmul.mubr.f32.vlgmr.msra.gmra.mrb[4].mxu0 %v568_v8  ;;  %708 = vmatmul.mubr.f32.vlgmr.msra.gmra.mrb[4].mxu1 %v568_v8 }
 0x189   :  { %2262 = vmatpush1.bf16.msra.mxu0 %v2995_v49  ;;  %2294 = vmatpush1.bf16.msra.mxu1 %v2998_v50 }
 0x18a   :  { %2264 = vmatprep.subr.bf16.mxu0 %v3000_v51  ;;  %2296 = vmatprep.subr.bf16.mxu1 %v3003_v55 }
 0x18b   :  { %842 = vmatprep.mubr.f32.mxu0 %v2903_v0  ;;  %913 = vmatprep.mubr.f32.mxu1 %v2903_v0 }
 0x18d   :  { %2266 = vmatpush1.bf16.msra.mxu0 %v3006_v61  ;;  %2298 = vmatpush1.bf16.msra.mxu1 %v3010_v62 }
 0x18e   :  { %2268 = vmatprep.subr.bf16.mxu0 %v3012_v63  ;;  %2300 = vmatprep.subr.bf16.mxu1 %v3015_v4 }
 0x191   :  { %2270 = vmatpush1.bf16.msra.mxu0 %v3020_v10  ;;  %2302 = vmatpush1.bf16.msra.mxu1 %v3024_v11 }
 0x192   :  { %2272 = vmatprep.subr.bf16.mxu0 %v3026_v12  ;;  %2304 = vmatprep.subr.bf16.mxu1 %v3029_v16 }
 0x195   :  { %2274 = vmatpush1.bf16.msra.mxu0 %v3032_v22  ;;  %2306 = vmatpush1.bf16.msra.mxu1 %v3036_v23 }
 0x196   :  { %2276 = vmatprep.subr.bf16.mxu0 %v3038_v24  ;;  %2308 = vmatprep.subr.bf16.mxu1 %v3041_v28 }
 0x199   :  { %2278 = vmatpush1.bf16.msra.mxu0 %v3044_v34  ;;  %2310 = vmatpush1.bf16.msra.mxu1 %v3048_v35 }
 0x19a   :  { %2280 = vmatprep.subr.bf16.mxu0 %v3050_v36  ;;  %2312 = vmatprep.subr.bf16.mxu1 %v3053_v41 }
 0x19d   :  { %2282 = vmatpush1.bf16.msra.mxu0 %v3056_v48  ;;  %2314 = vmatpush1.bf16.msra.mxu1 %v3060_v52 }
 0x19e   :  { %2284 = vmatprep.subr.bf16.mxu0 %v3062_v53  ;;  %2316 = vmatprep.subr.bf16.mxu1 %v3065_v58 }
 0x1a1   :  { %2286 = vmatpush1.bf16.msra.mxu0 %v3068_v5  ;;  %2318 = vmatpush1.bf16.msra.mxu1 %v3072_v6 }
 0x1a2   :  { %2288 = vmatprep.subr.bf16.mxu0 %v3074_v7  ;;  %2320 = vmatprep.subr.bf16.mxu1 %v3077_v13 }
 0x1a5   :  { %2290 = vmatpush1.bf16.msra.mxu0 %v3080_v17  ;;  %2322 = vmatpush1.bf16.msra.mxu1 %v3084_v18 }
 0x1a6   :  { %2324 = vmatprep.subr.bf16.mxu0 %v2991_v38  ;;  %2356 = vmatprep.subr.bf16.mxu1 %v2993_v42 }
 0x25b   :  { %v638_v9 = vpop.f32.mrb[4].mxu0  ;;  %v709_v14 = vpop.f32.mrb[4].mxu1 }
 0x25c   :  { %v640_v15 = vpop.f32.mrb[5].mxu0  ;;  %v711_v19 = vpop.f32.mrb[5].mxu1 }
 0x25d   :  { %v718_v20 = vcombine.low %v638_v9, %v640_v15  ;;  %v719_v25 = vcombine.low %v709_v14, %v711_v19 }
 0x25f   :  { %v726_v26 = vrot.slane %v718_v20, %v3131_v60  ;;  %v733_v27 = vrot.slane %v719_v25, %v3131_v60 }
 0x261   :  { %v734_v29 = vcombine.low %v726_v26, %v733_v27 }
 0x263   :  { %v741_v30 = vrot.slane %v734_v29, %v3131_v60 }
 0x265   :  { %v743_v31 = vadd.f32 %v741_v30, %v571_v21 }
 0x267   :  { %v2046_v32 = vmul.f32 -1.442695, %v743_v31  ;;  %v751_v33 = vrot.slane %v743_v31, 1  ;;  %v762_v39 = vrot.slane %v743_v31, 3  ;;  %v759_v44 = vrot.slane %v743_v31, 2 }
 0x269   :  { %2668 = vpow2.f32 %v2046_v32  ;;  %v2047_v37 = vmul.f32 -1.442695, %v751_v33  ;;  %v2048_v40 = vmul.f32 -1.442695, %v762_v39 }
 0x26a   :  { %v777_v33 = vld [vmem:[#allocation2 + $0x2] ss:$8 sm:$0xf] }
 0x26b   :  { %2670 = vpow2.f32 %v2047_v37 }
 0x26c   :  { %2672 = vpow2.f32 %v2048_v40 }
 0x273   :  { %v2669_v43 = vpop.eup %2668 }
 0x274   :  { %v747_v45 = vadd.f32 1.0, %v2669_v43 }
 0x275   :  { %v2671_v46 = vpop.eup %2670 }
 0x276   :  { %2674 = vrcp.f32 %v747_v45  ;;  %v756_v47 = vadd.f32 1.0, %v2671_v46  ;;  %v2673_v54 = vpop.eup %2672 }
 0x277   :  { %2676 = vtanh.f32 %v759_v44  ;;  %v767_v2 = vadd.f32 1.0, %v2673_v54 }
 0x278   :  { %2678 = vrcp.f32 %v756_v47 }
 0x279   :  { %2680 = vrcp.f32 %v767_v2 }
 0x280   :  { %v2675_v56 = vpop.eup %2674 }
 0x281   :  { %v2677_v57 = vpop.eup %2676 }
 0x282   :  { %v2679_v59 = vpop.eup %2678  ;;  %v771_v8 = vmul.f32 %v2677_v57, %v2675_v56 }
 0x283   :  { %v770_v3 = vmul.f32 %v2679_v59, %v3139_v1  ;;  %v2681_v14 = vpop.eup %2680 }
 0x285   :  { %v3180_v9 = vadd.f32 %v771_v8, %v770_v3 }
 0x287   :  { %2682 = vtanh.f32 %v3180_v9 }
 0x291   :  { %v2683_v15 = vpop.eup %2682 }
 0x292   :  { %v774_v19 = vmul.f32 %v2683_v15, %v2681_v14 }
 0x294   :  { %775 = vst [vmem:[#allocation9 + $0x1] sm:$0x1] %v774_v19  ;;  %843 = vmatmul.mubr.f32.vlgmr.msra.gmra.mrb[6].mxu0 %v774_v19  ;;  %914 = vmatmul.mubr.f32.vlgmr.msra.gmra.mrb[6].mxu1 %v774_v19 }
 0x295   :  { %2326 = vmatpush1.bf16.msra.mxu0 %v2995_v49  ;;  %2358 = vmatpush1.bf16.msra.mxu1 %v2998_v50 }
 0x296   :  { %2328 = vmatprep.subr.bf16.mxu0 %v3000_v51  ;;  %2360 = vmatprep.subr.bf16.mxu1 %v3003_v55 }
 0x297   :  { %1048 = vmatprep.mubr.f32.mxu0 %v2903_v0  ;;  %1119 = vmatprep.mubr.f32.mxu1 %v2903_v0 }
 0x299   :  { %2330 = vmatpush1.bf16.msra.mxu0 %v3006_v61  ;;  %2362 = vmatpush1.bf16.msra.mxu1 %v3010_v62 }
 0x29a   :  { %2332 = vmatprep.subr.bf16.mxu0 %v3012_v63  ;;  %2364 = vmatprep.subr.bf16.mxu1 %v3015_v4 }
 0x29d   :  { %2334 = vmatpush1.bf16.msra.mxu0 %v3020_v10  ;;  %2366 = vmatpush1.bf16.msra.mxu1 %v3024_v11 }
 0x29e   :  { %2336 = vmatprep.subr.bf16.mxu0 %v3026_v12  ;;  %2368 = vmatprep.subr.bf16.mxu1 %v3029_v16 }
 0x2a1   :  { %2338 = vmatpush1.bf16.msra.mxu0 %v3032_v22  ;;  %2370 = vmatpush1.bf16.msra.mxu1 %v3036_v23 }
 0x2a2   :  { %2340 = vmatprep.subr.bf16.mxu0 %v3038_v24  ;;  %2372 = vmatprep.subr.bf16.mxu1 %v3041_v28 }
 0x2a5   :  { %2342 = vmatpush1.bf16.msra.mxu0 %v3044_v34  ;;  %2374 = vmatpush1.bf16.msra.mxu1 %v3048_v35 }
 0x2a6   :  { %2344 = vmatprep.subr.bf16.mxu0 %v3050_v36  ;;  %2376 = vmatprep.subr.bf16.mxu1 %v3053_v41 }
 0x2a9   :  { %2346 = vmatpush1.bf16.msra.mxu0 %v3056_v48  ;;  %2378 = vmatpush1.bf16.msra.mxu1 %v3060_v52 }
 0x2aa   :  { %2348 = vmatprep.subr.bf16.mxu0 %v3062_v53  ;;  %2380 = vmatprep.subr.bf16.mxu1 %v3065_v58 }
 0x2ad   :  { %2350 = vmatpush1.bf16.msra.mxu0 %v3068_v5  ;;  %2382 = vmatpush1.bf16.msra.mxu1 %v3072_v6 }
 0x2ae   :  { %2352 = vmatprep.subr.bf16.mxu0 %v3074_v7  ;;  %2384 = vmatprep.subr.bf16.mxu1 %v3077_v13 }
 0x2b1   :  { %2354 = vmatpush1.bf16.msra.mxu0 %v3080_v17  ;;  %2386 = vmatpush1.bf16.msra.mxu1 %v3084_v18 }
 0x2b2   :  { %2388 = vmatprep.subr.bf16.mxu0 %v2991_v38  ;;  %2420 = vmatprep.subr.bf16.mxu1 %v2993_v42 }
 0x367   :  { %v844_v1 = vpop.f32.mrb[6].mxu0  ;;  %v915_v20 = vpop.f32.mrb[6].mxu1 }
 0x368   :  { %v846_v25 = vpop.f32.mrb[7].mxu0  ;;  %v917_v26 = vpop.f32.mrb[7].mxu1 }
 0x369   :  { %v924_v27 = vcombine.low %v844_v1, %v846_v25  ;;  %v925_v29 = vcombine.low %v915_v20, %v917_v26 }
 0x36b   :  { %v932_v30 = vrot.slane %v924_v27, %v3131_v60  ;;  %v939_v21 = vrot.slane %v925_v29, %v3131_v60 }
 0x36d   :  { %v940_v31 = vcombine.low %v932_v30, %v939_v21 }
 0x36f   :  { %v947_v32 = vrot.slane %v940_v31, %v3131_v60 }
 0x371   :  { %v949_v37 = vadd.f32 %v947_v32, %v777_v33 }
 0x373   :  { %v2049_v39 = vmul.f32 -1.442695, %v949_v37  ;;  %v957_v40 = vrot.slane %v949_v37, 1  ;;  %v968_v44 = vrot.slane %v949_v37, 3  ;;  %v965_v47 = vrot.slane %v949_v37, 2 }
 0x375   :  { %2684 = vpow2.f32 %v2049_v39  ;;  %v2050_v43 = vmul.f32 -1.442695, %v957_v40  ;;  %v2051_v45 = vmul.f32 -1.442695, %v968_v44 }
 0x376   :  { %v983_v40 = vld [vmem:[#allocation2 + $0x3] ss:$8 sm:$0xf] }
 0x377   :  { %2686 = vpow2.f32 %v2050_v43 }
 0x378   :  { %2688 = vpow2.f32 %v2051_v45 }
 0x37f   :  { %v2685_v46 = vpop.eup %2684 }
 0x380   :  { %v953_v54 = vadd.f32 1.0, %v2685_v46 }
 0x381   :  { %v2687_v56 = vpop.eup %2686 }
 0x382   :  { %2690 = vrcp.f32 %v953_v54  ;;  %v962_v57 = vadd.f32 1.0, %v2687_v56  ;;  %v2689_v59 = vpop.eup %2688 }
 0x383   :  { %2692 = vtanh.f32 %v965_v47  ;;  %v973_v14 = vadd.f32 1.0, %v2689_v59 }
 0x384   :  { %2694 = vrcp.f32 %v962_v57 }
 0x385   :  { %2696 = vrcp.f32 %v973_v14 }
 0x38c   :  { %v2691_v2 = vpop.eup %2690 }
 0x38d   :  { %v2693_v3 = vpop.eup %2692 }
 0x38e   :  { %v2695_v8 = vpop.eup %2694  ;;  %v977_v19 = vmul.f32 %v2693_v3, %v2691_v2 }
 0x38f   :  { %v976_v15 = vmul.f32 %v2695_v8, %v3180_v9  ;;  %v2697_v20 = vpop.eup %2696 }
 0x391   :  { %v3221_v1 = vadd.f32 %v977_v19, %v976_v15 }
 0x393   :  { %2698 = vtanh.f32 %v3221_v1 }
 0x39d   :  { %v2699_v25 = vpop.eup %2698 }
 0x39e   :  { %v980_v26 = vmul.f32 %v2699_v25, %v2697_v20 }
 0x3a0   :  { %981 = vst [vmem:[#allocation9 + $0x2] sm:$0x1] %v980_v26  ;;  %1049 = vmatmul.mubr.f32.vlgmr.msra.gmra.mrb[8].mxu0 %v980_v26  ;;  %1120 = vmatmul.mubr.f32.vlgmr.msra.gmra.mrb[8].mxu1 %v980_v26 }
 0x3a1   :  { %2390 = vmatpush1.bf16.msra.mxu0 %v2995_v49  ;;  %2422 = vmatpush1.bf16.msra.mxu1 %v2998_v50 }
 0x3a2   :  { %2392 = vmatprep.subr.bf16.mxu0 %v3000_v51  ;;  %2424 = vmatprep.subr.bf16.mxu1 %v3003_v55 }
 0x3a3   :  { %1254 = vmatprep.mubr.f32.mxu0 %v2903_v0  ;;  %1325 = vmatprep.mubr.f32.mxu1 %v2903_v0 }
 0x3a5   :  { %2394 = vmatpush1.bf16.msra.mxu0 %v3006_v61  ;;  %2426 = vmatpush1.bf16.msra.mxu1 %v3010_v62 }
 0x3a6   :  { %2396 = vmatprep.subr.bf16.mxu0 %v3012_v63  ;;  %2428 = vmatprep.subr.bf16.mxu1 %v3015_v4 }
 0x3a9   :  { %2398 = vmatpush1.bf16.msra.mxu0 %v3020_v10  ;;  %2430 = vmatpush1.bf16.msra.mxu1 %v3024_v11 }
 0x3aa   :  { %2400 = vmatprep.subr.bf16.mxu0 %v3026_v12  ;;  %2432 = vmatprep.subr.bf16.mxu1 %v3029_v16 }
 0x3ad   :  { %2402 = vmatpush1.bf16.msra.mxu0 %v3032_v22  ;;  %2434 = vmatpush1.bf16.msra.mxu1 %v3036_v23 }
 0x3ae   :  { %2404 = vmatprep.subr.bf16.mxu0 %v3038_v24  ;;  %2436 = vmatprep.subr.bf16.mxu1 %v3041_v28 }
 0x3b1   :  { %2406 = vmatpush1.bf16.msra.mxu0 %v3044_v34  ;;  %2438 = vmatpush1.bf16.msra.mxu1 %v3048_v35 }
 0x3b2   :  { %2408 = vmatprep.subr.bf16.mxu0 %v3050_v36  ;;  %2440 = vmatprep.subr.bf16.mxu1 %v3053_v41 }
 0x3b5   :  { %2410 = vmatpush1.bf16.msra.mxu0 %v3056_v48  ;;  %2442 = vmatpush1.bf16.msra.mxu1 %v3060_v52 }
 0x3b6   :  { %2412 = vmatprep.subr.bf16.mxu0 %v3062_v53  ;;  %2444 = vmatprep.subr.bf16.mxu1 %v3065_v58 }
 0x3b9   :  { %2414 = vmatpush1.bf16.msra.mxu0 %v3068_v5  ;;  %2446 = vmatpush1.bf16.msra.mxu1 %v3072_v6 }
 0x3ba   :  { %2416 = vmatprep.subr.bf16.mxu0 %v3074_v7  ;;  %2448 = vmatprep.subr.bf16.mxu1 %v3077_v13 }
 0x3bd   :  { %2418 = vmatpush1.bf16.msra.mxu0 %v3080_v17  ;;  %2450 = vmatpush1.bf16.msra.mxu1 %v3084_v18 }
 0x3be   :  { %2452 = vmatprep.subr.bf16.mxu0 %v2991_v38  ;;  %2484 = vmatprep.subr.bf16.mxu1 %v2993_v42 }
 0x473   :  { %v1050_v9 = vpop.f32.mrb[8].mxu0  ;;  %v1121_v27 = vpop.f32.mrb[8].mxu1 }
 0x474   :  { %v1052_v29 = vpop.f32.mrb[9].mxu0  ;;  %v1123_v30 = vpop.f32.mrb[9].mxu1 }
 0x475   :  { %v1130_v21 = vcombine.low %v1050_v9, %v1052_v29  ;;  %v1131_v31 = vcombine.low %v1121_v27, %v1123_v30 }
 0x477   :  { %v1138_v32 = vrot.slane %v1130_v21, %v3131_v60  ;;  %v1145_v33 = vrot.slane %v1131_v31, %v3131_v60 }
 0x479   :  { %v1146_v37 = vcombine.low %v1138_v32, %v1145_v33 }
 0x47b   :  { %v1153_v39 = vrot.slane %v1146_v37, %v3131_v60 }
 0x47d   :  { %v1155_v43 = vadd.f32 %v1153_v39, %v983_v40 }
 0x47f   :  { %v2052_v44 = vmul.f32 -1.442695, %v1155_v43  ;;  %v1163_v45 = vrot.slane %v1155_v43, 1  ;;  %v1174_v47 = vrot.slane %v1155_v43, 3  ;;  %v1171_v57 = vrot.slane %v1155_v43, 2 }
 0x481   :  { %2700 = vpow2.f32 %v2052_v44  ;;  %v2053_v46 = vmul.f32 -1.442695, %v1163_v45  ;;  %v2054_v54 = vmul.f32 -1.442695, %v1174_v47 }
 0x482   :  { %v1189_v45 = vld [vmem:[#allocation2 + $0x4] ss:$8 sm:$0xf] }
 0x483   :  { %2702 = vpow2.f32 %v2053_v46 }
 0x484   :  { %2704 = vpow2.f32 %v2054_v54 }
 0x48b   :  { %v2701_v56 = vpop.eup %2700 }
 0x48c   :  { %v1159_v59 = vadd.f32 1.0, %v2701_v56 }
 0x48d   :  { %v2703_v2 = vpop.eup %2702 }
 0x48e   :  { %2706 = vrcp.f32 %v1159_v59  ;;  %v1168_v3 = vadd.f32 1.0, %v2703_v2  ;;  %v2705_v8 = vpop.eup %2704 }
 0x48f   :  { %2708 = vtanh.f32 %v1171_v57  ;;  %v1179_v20 = vadd.f32 1.0, %v2705_v8 }
 0x490   :  { %2710 = vrcp.f32 %v1168_v3 }
 0x491   :  { %2712 = vrcp.f32 %v1179_v20 }
 0x498   :  { %v2707_v14 = vpop.eup %2706 }
 0x499   :  { %v2709_v15 = vpop.eup %2708 }
 0x49a   :  { %v2711_v19 = vpop.eup %2710  ;;  %v1183_v26 = vmul.f32 %v2709_v15, %v2707_v14 }
 0x49b   :  { %v1182_v25 = vmul.f32 %v2711_v19, %v3221_v1  ;;  %v2713_v27 = vpop.eup %2712 }
 0x49d   :  { %v3262_v9 = vadd.f32 %v1183_v26, %v1182_v25 }
 0x49f   :  { %2714 = vtanh.f32 %v3262_v9 }
 0x4a9   :  { %v2715_v29 = vpop.eup %2714 }
 0x4aa   :  { %v1186_v30 = vmul.f32 %v2715_v29, %v2713_v27 }
 0x4ac   :  { %1187 = vst [vmem:[#allocation9 + $0x3] sm:$0x1] %v1186_v30  ;;  %1255 = vmatmul.mubr.f32.vlgmr.msra.gmra.mrb[10].mxu0 %v1186_v30  ;;  %1326 = vmatmul.mubr.f32.vlgmr.msra.gmra.mrb[10].mxu1 %v1186_v30 }
 0x4ad   :  { %2454 = vmatpush1.bf16.msra.mxu0 %v2995_v49  ;;  %2486 = vmatpush1.bf16.msra.mxu1 %v2998_v50 }
 0x4ae   :  { %2456 = vmatprep.subr.bf16.mxu0 %v3000_v51  ;;  %2488 = vmatprep.subr.bf16.mxu1 %v3003_v55 }
 0x4af   :  { %1460 = vmatprep.mubr.f32.mxu0 %v2903_v0  ;;  %1531 = vmatprep.mubr.f32.mxu1 %v2903_v0 }
 0x4b1   :  { %2458 = vmatpush1.bf16.msra.mxu0 %v3006_v61  ;;  %2490 = vmatpush1.bf16.msra.mxu1 %v3010_v62 }
 0x4b2   :  { %2460 = vmatprep.subr.bf16.mxu0 %v3012_v63  ;;  %2492 = vmatprep.subr.bf16.mxu1 %v3015_v4 }
 0x4b5   :  { %2462 = vmatpush1.bf16.msra.mxu0 %v3020_v10  ;;  %2494 = vmatpush1.bf16.msra.mxu1 %v3024_v11 }
 0x4b6   :  { %2464 = vmatprep.subr.bf16.mxu0 %v3026_v12  ;;  %2496 = vmatprep.subr.bf16.mxu1 %v3029_v16 }
 0x4b9   :  { %2466 = vmatpush1.bf16.msra.mxu0 %v3032_v22  ;;  %2498 = vmatpush1.bf16.msra.mxu1 %v3036_v23 }
 0x4ba   :  { %2468 = vmatprep.subr.bf16.mxu0 %v3038_v24  ;;  %2500 = vmatprep.subr.bf16.mxu1 %v3041_v28 }
 0x4bd   :  { %2470 = vmatpush1.bf16.msra.mxu0 %v3044_v34  ;;  %2502 = vmatpush1.bf16.msra.mxu1 %v3048_v35 }
 0x4be   :  { %2472 = vmatprep.subr.bf16.mxu0 %v3050_v36  ;;  %2504 = vmatprep.subr.bf16.mxu1 %v3053_v41 }
 0x4c1   :  { %2474 = vmatpush1.bf16.msra.mxu0 %v3056_v48  ;;  %2506 = vmatpush1.bf16.msra.mxu1 %v3060_v52 }
 0x4c2   :  { %2476 = vmatprep.subr.bf16.mxu0 %v3062_v53  ;;  %2508 = vmatprep.subr.bf16.mxu1 %v3065_v58 }
 0x4c5   :  { %2478 = vmatpush1.bf16.msra.mxu0 %v3068_v5  ;;  %2510 = vmatpush1.bf16.msra.mxu1 %v3072_v6 }
 0x4c6   :  { %2480 = vmatprep.subr.bf16.mxu0 %v3074_v7  ;;  %2512 = vmatprep.subr.bf16.mxu1 %v3077_v13 }
 0x4c9   :  { %2482 = vmatpush1.bf16.msra.mxu0 %v3080_v17  ;;  %2514 = vmatpush1.bf16.msra.mxu1 %v3084_v18 }
 0x4ca   :  { %2516 = vmatprep.subr.bf16.mxu0 %v2991_v38  ;;  %2548 = vmatprep.subr.bf16.mxu1 %v2993_v42 }
 0x57f   :  { %v1256_v1 = vpop.f32.mrb[10].mxu0  ;;  %v1327_v21 = vpop.f32.mrb[10].mxu1 }
 0x580   :  { %v1258_v31 = vpop.f32.mrb[11].mxu0  ;;  %v1329_v32 = vpop.f32.mrb[11].mxu1 }
 0x581   :  { %v1336_v33 = vcombine.low %v1256_v1, %v1258_v31  ;;  %v1337_v37 = vcombine.low %v1327_v21, %v1329_v32 }
 0x583   :  { %v1344_v39 = vrot.slane %v1336_v33, %v3131_v60  ;;  %v1351_v40 = vrot.slane %v1337_v37, %v3131_v60 }
 0x585   :  { %v1352_v43 = vcombine.low %v1344_v39, %v1351_v40 }
 0x587   :  { %v1359_v44 = vrot.slane %v1352_v43, %v3131_v60 }
 0x589   :  { %v1361_v46 = vadd.f32 %v1359_v44, %v1189_v45 }
 0x58b   :  { %v2055_v47 = vmul.f32 -1.442695, %v1361_v46  ;;  %v1369_v54 = vrot.slane %v1361_v46, 1  ;;  %v1380_v57 = vrot.slane %v1361_v46, 3  ;;  %v1377_v3 = vrot.slane %v1361_v46, 2 }
 0x58d   :  { %2716 = vpow2.f32 %v2055_v47  ;;  %v2056_v56 = vmul.f32 -1.442695, %v1369_v54  ;;  %v2057_v59 = vmul.f32 -1.442695, %v1380_v57 }
 0x58e   :  { %v1395_v54 = vld [vmem:[#allocation2 + $0x5] ss:$8 sm:$0xf] }
 0x58f   :  { %2718 = vpow2.f32 %v2056_v56 }
 0x590   :  { %2720 = vpow2.f32 %v2057_v59 }
 0x597   :  { %v2717_v2 = vpop.eup %2716 }
 0x598   :  { %v1365_v8 = vadd.f32 1.0, %v2717_v2 }
 0x599   :  { %v2719_v14 = vpop.eup %2718 }
 0x59a   :  { %2722 = vrcp.f32 %v1365_v8  ;;  %v1374_v15 = vadd.f32 1.0, %v2719_v14  ;;  %v2721_v19 = vpop.eup %2720 }
 0x59b   :  { %2724 = vtanh.f32 %v1377_v3  ;;  %v1385_v27 = vadd.f32 1.0, %v2721_v19 }
 0x59c   :  { %2726 = vrcp.f32 %v1374_v15 }
 0x59d   :  { %2728 = vrcp.f32 %v1385_v27 }
 0x5a4   :  { %v2723_v20 = vpop.eup %2722 }
 0x5a5   :  { %v2725_v25 = vpop.eup %2724 }
 0x5a6   :  { %v2727_v26 = vpop.eup %2726  ;;  %v1389_v30 = vmul.f32 %v2725_v25, %v2723_v20 }
 0x5a7   :  { %v1388_v29 = vmul.f32 %v2727_v26, %v3262_v9  ;;  %v2729_v21 = vpop.eup %2728 }
 0x5a9   :  { %v3303_v1 = vadd.f32 %v1389_v30, %v1388_v29 }
 0x5ab   :  { %2730 = vtanh.f32 %v3303_v1 }
 0x5b5   :  { %v2731_v31 = vpop.eup %2730 }
 0x5b6   :  { %v1392_v32 = vmul.f32 %v2731_v31, %v2729_v21 }
 0x5b8   :  { %1393 = vst [vmem:[#allocation9 + $0x4] sm:$0x1] %v1392_v32  ;;  %1461 = vmatmul.mubr.f32.vlgmr.msra.gmra.mrb[12].mxu0 %v1392_v32  ;;  %1532 = vmatmul.mubr.f32.vlgmr.msra.gmra.mrb[12].mxu1 %v1392_v32 }
 0x5b9   :  { %2518 = vmatpush1.bf16.msra.mxu0 %v2995_v49  ;;  %2550 = vmatpush1.bf16.msra.mxu1 %v2998_v50 }
 0x5ba   :  { %2520 = vmatprep.subr.bf16.mxu0 %v3000_v51  ;;  %2552 = vmatprep.subr.bf16.mxu1 %v3003_v55 }
 0x5bb   :  { %1666 = vmatprep.mubr.f32.mxu0 %v2903_v0  ;;  %1737 = vmatprep.mubr.f32.mxu1 %v2903_v0 }
 0x5bd   :  { %2522 = vmatpush1.bf16.msra.mxu0 %v3006_v61  ;;  %2554 = vmatpush1.bf16.msra.mxu1 %v3010_v62 }
 0x5be   :  { %2524 = vmatprep.subr.bf16.mxu0 %v3012_v63  ;;  %2556 = vmatprep.subr.bf16.mxu1 %v3015_v4 }
 0x5c1   :  { %2526 = vmatpush1.bf16.msra.mxu0 %v3020_v10  ;;  %2558 = vmatpush1.bf16.msra.mxu1 %v3024_v11 }
 0x5c2   :  { %2528 = vmatprep.subr.bf16.mxu0 %v3026_v12  ;;  %2560 = vmatprep.subr.bf16.mxu1 %v3029_v16 }
 0x5c5   :  { %2530 = vmatpush1.bf16.msra.mxu0 %v3032_v22  ;;  %2562 = vmatpush1.bf16.msra.mxu1 %v3036_v23 }
 0x5c6   :  { %2532 = vmatprep.subr.bf16.mxu0 %v3038_v24  ;;  %2564 = vmatprep.subr.bf16.mxu1 %v3041_v28 }
 0x5c9   :  { %2534 = vmatpush1.bf16.msra.mxu0 %v3044_v34  ;;  %2566 = vmatpush1.bf16.msra.mxu1 %v3048_v35 }
 0x5ca   :  { %2536 = vmatprep.subr.bf16.mxu0 %v3050_v36  ;;  %2568 = vmatprep.subr.bf16.mxu1 %v3053_v41 }
 0x5cd   :  { %2538 = vmatpush1.bf16.msra.mxu0 %v3056_v48  ;;  %2570 = vmatpush1.bf16.msra.mxu1 %v3060_v52 }
 0x5ce   :  { %2540 = vmatprep.subr.bf16.mxu0 %v3062_v53  ;;  %2572 = vmatprep.subr.bf16.mxu1 %v3065_v58 }
 0x5d1   :  { %2542 = vmatpush1.bf16.msra.mxu0 %v3068_v5  ;;  %2574 = vmatpush1.bf16.msra.mxu1 %v3072_v6 }
 0x5d2   :  { %2544 = vmatprep.subr.bf16.mxu0 %v3074_v7  ;;  %2576 = vmatprep.subr.bf16.mxu1 %v3077_v13 }
 0x5d5   :  { %2546 = vmatpush1.bf16.msra.mxu0 %v3080_v17  ;;  %2578 = vmatpush1.bf16.msra.mxu1 %v3084_v18 }
 0x5d6   :  { %2580 = vmatprep.subr.bf16.mxu0 %v2991_v38  ;;  %2612 = vmatprep.subr.bf16.mxu1 %v2993_v42 }
 0x68b   :  { %v1462_v9 = vpop.f32.mrb[12].mxu0  ;;  %v1533_v33 = vpop.f32.mrb[12].mxu1 }
 0x68c   :  { %v1464_v37 = vpop.f32.mrb[13].mxu0  ;;  %v1535_v39 = vpop.f32.mrb[13].mxu1 }
 0x68d   :  { %v1542_v40 = vcombine.low %v1462_v9, %v1464_v37  ;;  %v1543_v43 = vcombine.low %v1533_v33, %v1535_v39 }
 0x68f   :  { %v1550_v44 = vrot.slane %v1542_v40, %v3131_v60  ;;  %v1557_v45 = vrot.slane %v1543_v43, %v3131_v60 }
 0x691   :  { %v1558_v46 = vcombine.low %v1550_v44, %v1557_v45 }
 0x693   :  { %v1565_v47 = vrot.slane %v1558_v46, %v3131_v60 }
 0x695   :  { %v1567_v56 = vadd.f32 %v1565_v47, %v1395_v54 }
 0x697   :  { %v2058_v57 = vmul.f32 -1.442695, %v1567_v56  ;;  %v1575_v59 = vrot.slane %v1567_v56, 1  ;;  %v1586_v42 = vrot.slane %v1567_v56, 3  ;;  %v1583_v8 = vrot.slane %v1567_v56, 2 }
 0x699   :  { %2732 = vpow2.f32 %v2058_v57  ;;  %v2059_v38 = vmul.f32 -1.442695, %v1575_v59  ;;  %v2060_v2 = vmul.f32 -1.442695, %v1586_v42 }
 0x69a   :  { %v1807_v59 = vld [vmem:[#allocation2 + $0x7] ss:$8 sm:$0xf] }
 0x69b   :  { %2734 = vpow2.f32 %v2059_v38 }
 0x69c   :  { %2736 = vpow2.f32 %v2060_v2 }
 0x6a3   :  { %v2733_v3 = vpop.eup %2732 }
 0x6a4   :  { %v1571_v14 = vadd.f32 1.0, %v2733_v3 }
 0x6a5   :  { %v2735_v15 = vpop.eup %2734 }
 0x6a6   :  { %2738 = vrcp.f32 %v1571_v14  ;;  %v1580_v19 = vadd.f32 1.0, %v2735_v15  ;;  %v2737_v20 = vpop.eup %2736 }
 0x6a7   :  { %2740 = vtanh.f32 %v1583_v8  ;;  %v1591_v29 = vadd.f32 1.0, %v2737_v20 }
 0x6a8   :  { %2742 = vrcp.f32 %v1580_v19 }
 0x6a9   :  { %2744 = vrcp.f32 %v1591_v29 }
 0x6b0   :  { %v2739_v25 = vpop.eup %2738 }
 0x6b1   :  { %v2741_v26 = vpop.eup %2740 }
 0x6b2   :  { %v2743_v27 = vpop.eup %2742  ;;  %v1595_v21 = vmul.f32 %v2741_v26, %v2739_v25 }
 0x6b3   :  { %v1594_v30 = vmul.f32 %v2743_v27, %v3303_v1  ;;  %v2745_v32 = vpop.eup %2744 }
 0x6b5   :  { %v3344_v31 = vadd.f32 %v1595_v21, %v1594_v30 }
 0x6b7   :  { %2746 = vtanh.f32 %v3344_v31 }
 0x6c1   :  { %v2747_v9 = vpop.eup %2746 }
 0x6c2   :  { %v1598_v33 = vmul.f32 %v2747_v9, %v2745_v32 }
 0x6c4   :  { %1599 = vst [vmem:[#allocation9 + $0x5] sm:$0x1] %v1598_v33  ;;  %1667 = vmatmul.mubr.f32.vlgmr.msra.gmra.mrb[14].mxu0 %v1598_v33  ;;  %1738 = vmatmul.mubr.f32.vlgmr.msra.gmra.mrb[14].mxu1 %v1598_v33 }
 0x6c5   :  { %2582 = vmatpush1.bf16.msra.mxu0 %v2995_v49  ;;  %2614 = vmatpush1.bf16.msra.mxu1 %v2998_v50 }
 0x6c6   :  { %2584 = vmatprep.subr.bf16.mxu0 %v3000_v51  ;;  %2616 = vmatprep.subr.bf16.mxu1 %v3003_v55 }
 0x6c7   :  { %1872 = vmatprep.mubr.f32.mxu0 %v2903_v0  ;;  %1943 = vmatprep.mubr.f32.mxu1 %v2903_v0 }
 0x6c9   :  { %2586 = vmatpush1.bf16.msra.mxu0 %v3006_v61  ;;  %2618 = vmatpush1.bf16.msra.mxu1 %v3010_v62 }
 0x6ca   :  { %2588 = vmatprep.subr.bf16.mxu0 %v3012_v63  ;;  %2620 = vmatprep.subr.bf16.mxu1 %v3015_v4 }
 0x6cd   :  { %2590 = vmatpush1.bf16.msra.mxu0 %v3020_v10  ;;  %2622 = vmatpush1.bf16.msra.mxu1 %v3024_v11  ;;  %v1601_v11 = vld [vmem:[#allocation2 + $0x6] ss:$8 sm:$0xf] }
 0x6ce   :  { %2592 = vmatprep.subr.bf16.mxu0 %v3026_v12  ;;  %2624 = vmatprep.subr.bf16.mxu1 %v3029_v16 }
 0x6d1   :  { %2594 = vmatpush1.bf16.msra.mxu0 %v3032_v22  ;;  %2626 = vmatpush1.bf16.msra.mxu1 %v3036_v23 }
 0x6d2   :  { %2596 = vmatprep.subr.bf16.mxu0 %v3038_v24  ;;  %2628 = vmatprep.subr.bf16.mxu1 %v3041_v28 }
 0x6d5   :  { %2598 = vmatpush1.bf16.msra.mxu0 %v3044_v34  ;;  %2630 = vmatpush1.bf16.msra.mxu1 %v3048_v35 }
 0x6d6   :  { %2600 = vmatprep.subr.bf16.mxu0 %v3050_v36  ;;  %2632 = vmatprep.subr.bf16.mxu1 %v3053_v41 }
 0x6d9   :  { %2602 = vmatpush1.bf16.msra.mxu0 %v3056_v48  ;;  %2634 = vmatpush1.bf16.msra.mxu1 %v3060_v52 }
 0x6da   :  { %2604 = vmatprep.subr.bf16.mxu0 %v3062_v53  ;;  %2636 = vmatprep.subr.bf16.mxu1 %v3065_v58 }
 0x6dd   :  { %2606 = vmatpush1.bf16.msra.mxu0 %v3068_v5  ;;  %2638 = vmatpush1.bf16.msra.mxu1 %v3072_v6 }
 0x6de   :  { %2608 = vmatprep.subr.bf16.mxu0 %v3074_v7  ;;  %2640 = vmatprep.subr.bf16.mxu1 %v3077_v13 }
 0x6e1   :  { %2610 = vmatpush1.bf16.msra.mxu0 %v3080_v17  ;;  %2642 = vmatpush1.bf16.msra.mxu1 %v3084_v18 }
 0x797   :  { %v1668_v0 = vpop.f32.mrb[14].mxu0  ;;  %v1739_v49 = vpop.f32.mrb[14].mxu1 }
 0x798   :  { %v1670_v50 = vpop.f32.mrb[15].mxu0  ;;  %v1741_v51 = vpop.f32.mrb[15].mxu1 }
 0x799   :  { %v1748_v55 = vcombine.low %v1668_v0, %v1670_v50  ;;  %v1749_v61 = vcombine.low %v1739_v49, %v1741_v51 }
 0x79b   :  { %v1756_v62 = vrot.slane %v1748_v55, %v3131_v60  ;;  %v1763_v63 = vrot.slane %v1749_v61, %v3131_v60 }
 0x79d   :  { %v1764_v4 = vcombine.low %v1756_v62, %v1763_v63 }
 0x79f   :  { %v1771_v10 = vrot.slane %v1764_v4, %v3131_v60 }
 0x7a1   :  { %v1773_v12 = vadd.f32 %v1771_v10, %v1601_v11 }
 0x7a3   :  { %v2061_v16 = vmul.f32 -1.442695, %v1773_v12  ;;  %v1781_v22 = vrot.slane %v1773_v12, 1  ;;  %v1792_v24 = vrot.slane %v1773_v12, 3  ;;  %v1789_v35 = vrot.slane %v1773_v12, 2 }
 0x7a5   :  { %2748 = vpow2.f32 %v2061_v16  ;;  %v2062_v23 = vmul.f32 -1.442695, %v1781_v22  ;;  %v2063_v28 = vmul.f32 -1.442695, %v1792_v24 }
 0x7a7   :  { %2750 = vpow2.f32 %v2062_v23 }
 0x7a8   :  { %2752 = vpow2.f32 %v2063_v28 }
 0x7af   :  { %v2749_v34 = vpop.eup %2748 }
 0x7b0   :  { %v1777_v36 = vadd.f32 1.0, %v2749_v34 }
 0x7b1   :  { %v2751_v41 = vpop.eup %2750 }
 0x7b2   :  { %2754 = vrcp.f32 %v1777_v36  ;;  %v1786_v48 = vadd.f32 1.0, %v2751_v41  ;;  %v2753_v52 = vpop.eup %2752 }
 0x7b3   :  { %2756 = vtanh.f32 %v1789_v35  ;;  %v1797_v6 = vadd.f32 1.0, %v2753_v52 }
 0x7b4   :  { %2758 = vrcp.f32 %v1786_v48 }
 0x7b5   :  { %2760 = vrcp.f32 %v1797_v6 }
 0x7bc   :  { %v2755_v53 = vpop.eup %2754 }
 0x7bd   :  { %v2757_v58 = vpop.eup %2756 }
 0x7be   :  { %v2759_v5 = vpop.eup %2758  ;;  %v1801_v13 = vmul.f32 %v2757_v58, %v2755_v53 }
 0x7bf   :  { %v1800_v7 = vmul.f32 %v2759_v5, %v3344_v31  ;;  %v2761_v18 = vpop.eup %2760 }
 0x7c1   :  { %v1802_v17 = vadd.f32 %v1801_v13, %v1800_v7 }
 0x7c3   :  { %2762 = vtanh.f32 %v1802_v17 }
 0x7cd   :  { %v2763_v1 = vpop.eup %2762 }
 0x7ce   :  { %v1804_v37 = vmul.f32 %v2763_v1, %v2761_v18 }
 0x7d0   :  { %1805 = vst [vmem:[#allocation9 + $0x6] sm:$0x1] %v1804_v37  ;;  %1873 = vmatmul.mubr.f32.vlgmr.msra.gmra.mrb[16].mxu0 %v1804_v37  ;;  %1944 = vmatmul.mubr.f32.vlgmr.msra.gmra.mrb[16].mxu1 %v1804_v37 }
 0x8a3   :  { %v1874_v39 = vpop.f32.mrb[16].mxu0  ;;  %v1945_v40 = vpop.f32.mrb[16].mxu1 }
 0x8a4   :  { %v1876_v43 = vpop.f32.mrb[17].mxu0  ;;  %v1947_v44 = vpop.f32.mrb[17].mxu1 }
 0x8a5   :  { %v1954_v45 = vcombine.low %v1874_v39, %v1876_v43  ;;  %v1955_v46 = vcombine.low %v1945_v40, %v1947_v44 }
 0x8a7   :  { %v1962_v47 = vrot.slane %v1954_v45, %v3131_v60  ;;  %v1969_v54 = vrot.slane %v1955_v46, %v3131_v60 }
 0x8a9   :  { %v1970_v56 = vcombine.low %v1962_v47, %v1969_v54 }
 0x8ab   :  { %v1977_v57 = vrot.slane %v1970_v56, %v3131_v60 }
 0x8ad   :  { %v1979_v38 = vadd.f32 %v1977_v57, %v1807_v59 }
 0x8af   :  { %v2064_v42 = vmul.f32 -1.442695, %v1979_v38  ;;  %v1987_v2 = vrot.slane %v1979_v38, 1  ;;  %v1998_v8 = vrot.slane %v1979_v38, 3  ;;  %v1995_v19 = vrot.slane %v1979_v38, 2 }
 0x8b1   :  { %2764 = vpow2.f32 %v2064_v42  ;;  %v2065_v3 = vmul.f32 -1.442695, %v1987_v2  ;;  %v2066_v14 = vmul.f32 -1.442695, %v1998_v8 }
 0x8b3   :  { %2766 = vpow2.f32 %v2065_v3 }
 0x8b4   :  { %2768 = vpow2.f32 %v2066_v14 }
 0x8bb   :  { %v2765_v15 = vpop.eup %2764 }
 0x8bc   :  { %v1983_v20 = vadd.f32 1.0, %v2765_v15 }
 0x8bd   :  { %v2767_v25 = vpop.eup %2766 }
 0x8be   :  { %2770 = vrcp.f32 %v1983_v20  ;;  %v1992_v26 = vadd.f32 1.0, %v2767_v25  ;;  %v2769_v27 = vpop.eup %2768 }
 0x8bf   :  { %2772 = vtanh.f32 %v1995_v19  ;;  %v2003_v21 = vadd.f32 1.0, %v2769_v27 }
 0x8c0   :  { %2774 = vrcp.f32 %v1992_v26 }
 0x8c1   :  { %2776 = vrcp.f32 %v2003_v21 }
 0x8c8   :  { %v2771_v60 = vpop.eup %2770 }
 0x8c9   :  { %v2773_v29 = vpop.eup %2772 }
 0x8ca   :  { %v2775_v30 = vpop.eup %2774  ;;  %v2007_v32 = vmul.f32 %v2773_v29, %v2771_v60 }
 0x8cb   :  { %v2006_v31 = vmul.f32 %v2775_v30, %v1802_v17 }
 0x8cd   :  { %v2008_v9 = vadd.f32 %v2007_v32, %v2006_v31 }
 0x8cf   :  { %2778 = vtanh.f32 %v2008_v9  ;;  %2012 = vst [vmem:[#allocation10] sm:$0x1] %v2008_v9 }
 0x8d0   :  { %2857 = shalt.err (!%p2854_p0)
}
 0x8d1   :  { %s2858_s22 = scalar_lea.hbm %s3417_s7, 16 }
 0x8d2   :  { %p2859_p1 = scmp.ne.s32.totalorder %s3417_s7, %s2858_s22  ;;  %p2862_p2 = scmp.lt.u32.totalorder %s2858_s22, %s3417_s7 }
 0x8d4   :  { %p2864_p3 = pnand %p2862_p2, %p2859_p1 }
 0x8d6   :  { %2867 = shalt.err (!%p2864_p3)
}
 0x8d7   :  { %2032 = dma.vmem_to_hbm [thread:$0]  %s2030_s17, 16, %s3417_s7, [#allocation11]   ;;  %v2777_v33 = vpop.eup %2776 }
 0x8d8   :  { %s2906_s28 = smov [#allocation9]  }
 0x8d9   :  { %s2019_s29 = sshll.u32 %s2906_s28, 4  ;;  %v2779_v0 = vpop.eup %2778  ;;  %s2020_s29 = int_to_ptr.vmem [resolvable:$true] %s2019_s29 }
 0x8da   :  { %v2010_v49 = vmul.f32 %v2779_v0, %v2777_v33  ;;  %s2868_s30 = scalar_lea.vmem %s2020_s29, 128  ;;  %p2873_p5 = scmp.lt.s32.totalorder %s2020_s29, %s2020_s29 }
 0x8db   :  { %p2869_p4 = scmp.ne.s32.totalorder %s2020_s29, %s2868_s30  ;;  %p2874_p6 = scmp.lt.s32.totalorder %s2868_s30, %s2868_s30 }
 0x8dc   :  { %2011 = vst [vmem:[#allocation9 + $0x7] sm:$0x1] %v2010_v49 }
 0x8dd   :  { %p2875_p7 = por %p2874_p6, %p2873_p5 }
 0x8df   :  { %p2876_p8 = pnand %p2875_p7, %p2869_p4 }
 0x8e1   :  { %2879 = shalt.err (!%p2876_p8)
}
 0x8e2   :  { %s2880_s10 = scalar_lea.hbm %s3416_s6, 128 }
 0x8e3   :  { %p2881_p9 = scmp.ne.s32.totalorder %s3416_s6, %s2880_s10  ;;  %p2884_p10 = scmp.lt.u32.totalorder %s2880_s10, %s3416_s6 }
 0x8e5   :  { %p2886_p11 = pnand %p2884_p10, %p2881_p9 }
 0x8e7   :  { %2889 = shalt.err (!%p2886_p11)
}
 0x8e8   :  { %2022 = dma.vmem_to_hbm [thread:$0]  %s2020_s29, 128, %s3416_s6, [#allocation5]  }
 0x8e9   :  { %2894 = dma.done.wait [#allocation5], 128  }
 0x8ea   :  { %2895 = vsyncadd [#allocation5], 4294967168 }
 0x8eb   :  { %2896 = dma.done.wait [#allocation11], 16  }
 0x8ec   :  { %2897 = vsyncadd [#allocation11], 4294967280 }
 0x8ed   :  { %2039 = vsyncpa [#allocation4], 1 }
 0x8ee   :  { %2040 = vsyncpa [#allocation7], 1 }
 0x8ef   :  { %2041 = vsyncpa [#allocation5], 1 }
 0x8f0   :  { %2042 = vsyncpa [#allocation11], 1 }

</bundles_post_ra>
